<compile_context>
chip_gen: v7x
topology: tpu7x:2x2x1
jax: 0.10.0
libtpu: 0.0.40
codegen_flags: <defaults>
</compile_context>

<pallas_src>
import math
from functools import partial

import jax
import jax.numpy as jnp
from jax import lax
from jax.experimental import pallas as pl
from jax.experimental.pallas import tpu as pltpu

NEG_INF = float(jnp.finfo(jnp.float32).min)
LN_EPS = 1e-5


# ----------------------------- in-kernel helpers ----------------------------

def _layernorm(x, g, b, eps=LN_EPS):
    mean = jnp.mean(x, axis=-1, keepdims=True)
    var = jnp.mean(jnp.square(x - mean), axis=-1, keepdims=True)
    return (x - mean) * lax.rsqrt(var + eps) * g + b


def _masked_softmax(scores, m):
    # scores: (Tq, Tk); m: (Tq, Tk) or (1, Tk) float, 1.0 = valid
    scores = jnp.where(m > 0, scores, NEG_INF)
    smax = jnp.max(scores, axis=-1, keepdims=True)
    e = jnp.exp(scores - smax)
    denom = jnp.sum(e, axis=-1, keepdims=True)
    attn = e * pl.reciprocal(denom, approx=True)
    return jnp.where(m > 0, attn, 0.0)  # matches torch masked_fill(..., 0.0)


# ------------------------------ Pallas kernels -------------------------------

def _embed_kernel(x_ref, w_ref, b_ref, pe_ref, o_ref, *, xscale):
    h = jnp.dot(x_ref[0], w_ref[...], preferred_element_type=jnp.float32) + b_ref[...]
    o_ref[0] = h * xscale + pe_ref[...]


def _self_attn_block_kernel(x_ref, mask_ref, g_ref, b_ref, wqkv_ref, bqkv_ref,
                            wo_ref, bo_ref, o_ref, *, heads, head_dim):
    x = x_ref[0]                                             # (T, D)
    D = heads * head_dim
    xn = _layernorm(x, g_ref[...], b_ref[...])
    qkv = jnp.dot(xn, wqkv_ref[...],
                  preferred_element_type=jnp.float32) + bqkv_ref[...]   # (T, 3D)
    m = mask_ref[0]                                          # (T, T)
    wo = wo_ref[...]                                         # (D, D)
    acc = jnp.zeros_like(x)
    for h in range(heads):                                   # static unroll over heads
        lo, hi = h * head_dim, (h + 1) * head_dim
        q = qkv[:, lo:hi]                                    # (T, dk) (pre-scaled)
        k = qkv[:, D + lo:D + hi]
        v = qkv[:, 2 * D + lo:2 * D + hi]
        s = lax.dot_general(q, k, (((1,), (1,)), ((), ())),
                            preferred_element_type=jnp.float32)          # (T, T)
        p = _masked_softmax(s, m)
        ctx = jnp.dot(p, v, preferred_element_type=jnp.float32)          # (T, dk)
        acc = acc + jnp.dot(ctx, wo[lo:hi, :], preferred_element_type=jnp.float32)
    o_ref[0] = x + acc + bo_ref[...]                         # residual fused


def _cross_attn_block_kernel(x_ref, mem_ref, mmask_ref, g_ref, b_ref,
                             wq_ref, bq_ref, wkv_ref, bkv_ref, wo_ref, bo_ref,
                             o_ref, *, heads, head_dim):
    x = x_ref[0]                                             # (T, D)
    mem = mem_ref[0]                                         # (S, D)
    D = heads * head_dim
    xn = _layernorm(x, g_ref[...], b_ref[...])
    q_all = jnp.dot(xn, wq_ref[...],
                    preferred_element_type=jnp.float32) + bq_ref[...]    # (T, D)
    kv = jnp.dot(mem, wkv_ref[...],
                 preferred_element_type=jnp.float32) + bkv_ref[...]      # (S, 2D)
    m = mmask_ref[0]                                         # (1, S)
    wo = wo_ref[...]
    acc = jnp.zeros_like(x)
    for h in range(heads):
        lo, hi = h * head_dim, (h + 1) * head_dim
        q = q_all[:, lo:hi]
        k = kv[:, lo:hi]
        v = kv[:, D + lo:D + hi]
        s = lax.dot_general(q, k, (((1,), (1,)), ((), ())),
                            preferred_element_type=jnp.float32)          # (T, S)
        p = _masked_softmax(s, m)
        ctx = jnp.dot(p, v, preferred_element_type=jnp.float32)          # (T, dk)
        acc = acc + jnp.dot(ctx, wo[lo:hi, :], preferred_element_type=jnp.float32)
    o_ref[0] = x + acc + bo_ref[...]


def _ffn_block_kernel(x_ref, g_ref, b_ref, w1_ref, b1_ref, w2_ref, b2_ref, o_ref):
    x = x_ref[0]
    xn = _layernorm(x, g_ref[...], b_ref[...])
    h = jnp.dot(xn, w1_ref[...], preferred_element_type=jnp.float32) + b1_ref[...]
    h = jnp.maximum(h, 0.0)
    o_ref[0] = x + jnp.dot(h, w2_ref[...], preferred_element_type=jnp.float32) + b2_ref[...]


def _final_kernel(x_ref, g_ref, b_ref, w_ref, bo_ref, o_ref):
    xn = _layernorm(x_ref[0], g_ref[...], b_ref[...])
    o_ref[0] = jnp.dot(xn, w_ref[...], preferred_element_type=jnp.float32) + bo_ref[...]


# ------------------------------ kernel wrappers ------------------------------

_PAR = pltpu.CompilerParams(dimension_semantics=("parallel",))


def _const2d(shape):
    return pl.BlockSpec(shape, lambda b: (0, 0))


def embed(ys, w, b, pe, xscale):
    B, T, V = ys.shape
    D = w.shape[1]
    return pl.pallas_call(
        partial(_embed_kernel, xscale=xscale),
        out_shape=jax.ShapeDtypeStruct((B, T, D), jnp.float32),
        grid=(B,),
        in_specs=[pl.BlockSpec((1, T, V), lambda bb: (bb, 0, 0)),
                  _const2d((V, D)), _const2d((1, D)), _const2d((T, D))],
        out_specs=pl.BlockSpec((1, T, D), lambda bb: (bb, 0, 0)),
        compiler_params=_PAR,
    )(ys, w, b, pe)


def self_attn_block(x, tgt_mask_f, p, H):
    B, T, D = x.shape
    return pl.pallas_call(
        partial(_self_attn_block_kernel, heads=H, head_dim=D // H),
        out_shape=jax.ShapeDtypeStruct((B, T, D), jnp.float32),
        grid=(B,),
        in_specs=[pl.BlockSpec((1, T, D), lambda b: (b, 0, 0)),
                  pl.BlockSpec((1, T, T), lambda b: (b, 0, 0)),
                  _const2d((1, D)), _const2d((1, D)),
                  _const2d((D, 3 * D)), _const2d((1, 3 * D)),
                  _const2d((D, D)), _const2d((1, D))],
        out_specs=pl.BlockSpec((1, T, D), lambda b: (b, 0, 0)),
        compiler_params=_PAR,
    )(x, tgt_mask_f, p['ln1_g'], p['ln1_b'], p['w_qkv'], p['b_qkv'],
      p['wo_self'], p['bo_self'])


def cross_attn_block(x, memory, mem_mask_f, p, H):
    B, T, D = x.shape
    S = memory.shape[1]
    return pl.pallas_call(
        partial(_cross_attn_block_kernel, heads=H, head_dim=D // H),
        out_shape=jax.ShapeDtypeStruct((B, T, D), jnp.float32),
        grid=(B,),
        in_specs=[pl.BlockSpec((1, T, D), lambda b: (b, 0, 0)),
                  pl.BlockSpec((1, S, D), lambda b: (b, 0, 0)),
                  pl.BlockSpec((1, 1, S), lambda b: (b, 0, 0)),
                  _const2d((1, D)), _const2d((1, D)),
                  _const2d((D, D)), _const2d((1, D)),
                  _const2d((D, 2 * D)), _const2d((1, 2 * D)),
                  _const2d((D, D)), _const2d((1, D))],
        out_specs=pl.BlockSpec((1, T, D), lambda b: (b, 0, 0)),
        compiler_params=_PAR,
    )(x, memory, mem_mask_f, p['ln2_g'], p['ln2_b'], p['wq_src'], p['bq_src'],
      p['w_kv_src'], p['b_kv_src'], p['wo_src'], p['bo_src'])


def ffn_block(x, p):
    B, T, D = x.shape
    FF = p['ffn_w1'].shape[1]
    return pl.pallas_call(
        _ffn_block_kernel,
        out_shape=jax.ShapeDtypeStruct((B, T, D), jnp.float32),
        grid=(B,),
        in_specs=[pl.BlockSpec((1, T, D), lambda b: (b, 0, 0)),
                  _const2d((1, D)), _const2d((1, D)),
                  _const2d((D, FF)), _const2d((1, FF)),
                  _const2d((FF, D)), _const2d((1, D))],
        out_specs=pl.BlockSpec((1, T, D), lambda b: (b, 0, 0)),
        compiler_params=_PAR,
    )(x, p['ln3_g'], p['ln3_b'], p['ffn_w1'], p['ffn_b1'], p['ffn_w2'], p['ffn_b2'])


def output_block(x, g, b, w, bo):
    B, T, D = x.shape
    V = w.shape[1]
    return pl.pallas_call(
        _final_kernel,
        out_shape=jax.ShapeDtypeStruct((B, T, V), jnp.float32),
        grid=(B,),
        in_specs=[pl.BlockSpec((1, T, D), lambda b: (b, 0, 0)),
                  _const2d((1, D)), _const2d((1, D)),
                  _const2d((D, V)), _const2d((1, V))],
        out_specs=pl.BlockSpec((1, T, V), lambda b: (b, 0, 0)),
        compiler_params=_PAR,
    )(x, g, b, w, bo)


# ------------------------------- model glue ----------------------------------

def transformer_decoder_forward(params, memory, memory_mask_f, ys_in_pad, ys_in_lens,
                                H, epoch=101, change_epoch=100):
    B, T, _ = ys_in_pad.shape
    D = memory.shape[-1]

    # tgt_mask = ~make_pad_mask(lens, T).unsqueeze(1) -> (B,1,T), True = valid key
    valid = jnp.arange(T)[None, :] < ys_in_lens[:, None]
    tgt_mask = valid[:, None, :]
    if epoch <= change_epoch:
        m = jnp.tril(jnp.ones((T, T), dtype=bool))[None]        # subsequent_mask
    else:
        m = jnp.ones((1, T, T), dtype=bool)                     # default path (epoch=101)
    tgt_mask_f = (tgt_mask & m).astype(jnp.float32)              # (B, T, T)

    # embed: Linear(V,D) then x*sqrt(D) + pe (dropout = identity)
    x = embed(ys_in_pad, params['embed_w'], params['embed_b'],
              params['pe'][:T], math.sqrt(D))

    for lp in params['layers']:
        x = self_attn_block(x, tgt_mask_f, lp, H)
        x = cross_attn_block(x, memory, memory_mask_f, lp, H)
        x = ffn_block(x, lp)

    out = output_block(x, params['after_norm_g'], params['after_norm_b'],
                       params['out_w'], params['out_b'])
    return out, jnp.float32(0.0), 1


@partial(jax.jit, static_argnames=("H", "reverse_weight"))
def bi_transformer_decoder_forward(params, memory, memory_mask, ys_in_pad, ys_in_lens,
                                   r_ys_in_pad, *, H, reverse_weight=0.0):
    mm_f = memory_mask.astype(jnp.float32)                       # (B, 1, S), 1.0 = valid
    l_x, _, olens = transformer_decoder_forward(
        params['left'], memory, mm_f, ys_in_pad, ys_in_lens, H)
    r_x = jnp.float32(0.0)
    if reverse_weight > 0.0:
        r_x, _, olens = transformer_decoder_forward(
            params['right'], memory, mm_f, r_ys_in_pad, ys_in_lens, H)
    return l_x, r_x, olens


# --------------------------- deterministic init ------------------------------

def _dense(key, shape, scale=0.02):
    return scale * jax.random.normal(key, shape, dtype=jnp.float32)


def _init_attn(key, D):
    ks = jax.random.split(key, 4)
    return {'wq': _dense(ks[0], (D, D)), 'bq': jnp.zeros((D,), jnp.float32),
            'wk': _dense(ks[1], (D, D)), 'bk': jnp.zeros((D,), jnp.float32),
            'wv': _dense(ks[2], (D, D)), 'bv': jnp.zeros((D,), jnp.float32),
            'wo': _dense(ks[3], (D, D)), 'bo': jnp.zeros((D,), jnp.float32)}


def sinusoidal_pe(max_len, D):
    pos = jnp.arange(max_len, dtype=jnp.float32)[:, None]
    div = jnp.exp(jnp.arange(0, D, 2, dtype=jnp.float32) * (-math.log(10000.0) / D))
    pe = jnp.zeros((max_len, D), jnp.float32)
    pe = pe.at[:, 0::2].set(jnp.sin(pos * div))
    pe = pe.at[:, 1::2].set(jnp.cos(pos * div))
    return pe


def init_raw_decoder_params(key, num_blocks, V, D, H, FF, max_len=64):
    keys = jax.random.split(key, 2 + max(num_blocks, 1))
    layers = []
    for i in range(num_blocks):
        lk = jax.random.split(keys[2 + i], 4)
        layers.append({
            'self_attn': _init_attn(lk[0], D), 'src_attn': _init_attn(lk[1], D),
            'ln1_g': jnp.ones((D,), jnp.float32), 'ln1_b': jnp.zeros((D,), jnp.float32),
            'ln2_g': jnp.ones((D,), jnp.float32), 'ln2_b': jnp.zeros((D,), jnp.float32),
            'ln3_g': jnp.ones((D,), jnp.float32), 'ln3_b': jnp.zeros((D,), jnp.float32),
            'ffn_w1': _dense(lk[2], (D, FF)), 'ffn_b1': jnp.zeros((FF,), jnp.float32),
            'ffn_w2': _dense(lk[3], (FF, D)), 'ffn_b2': jnp.zeros((D,), jnp.float32)})
    return {'pe': sinusoidal_pe(max_len, D),
            'embed_w': _dense(keys[0], (V, D)), 'embed_b': jnp.zeros((D,), jnp.float32),
            'after_norm_g': jnp.ones((D,), jnp.float32),
            'after_norm_b': jnp.zeros((D,), jnp.float32),
            'out_w': _dense(keys[1], (D, V)), 'out_b': jnp.zeros((V,), jnp.float32),
            'layers': layers}


def fuse_decoder_params(raw, H):
    """Concatenate Q/K/V (and cross K/V) weights, fold 1/sqrt(dk) into Wq/bq,
    reshape LN/bias vectors to (1, D) for the fused kernels."""
    D = raw['after_norm_g'].shape[0]
    scale = 1.0 / math.sqrt(D // H)
    layers = []
    for lp in raw['layers']:
        sa, ca = lp['self_attn'], lp['src_attn']
        layers.append({
            'ln1_g': lp['ln1_g'].reshape(1, D), 'ln1_b': lp['ln1_b'].reshape(1, D),
            'w_qkv': jnp.concatenate([sa['wq'] * scale, sa['wk'], sa['wv']], axis=1),
            'b_qkv': jnp.concatenate([sa['bq'] * scale, sa['bk'], sa['bv']]).reshape(1, 3 * D),
            'wo_self': sa['wo'], 'bo_self': sa['bo'].reshape(1, D),
            'ln2_g': lp['ln2_g'].reshape(1, D), 'ln2_b': lp['ln2_b'].reshape(1, D),
            'wq_src': ca['wq'] * scale, 'bq_src': (ca['bq'] * scale).reshape(1, D),
            'w_kv_src': jnp.concatenate([ca['wk'], ca['wv']], axis=1),
            'b_kv_src': jnp.concatenate([ca['bk'], ca['bv']]).reshape(1, 2 * D),
            'wo_src': ca['wo'], 'bo_src': ca['bo'].reshape(1, D),
            'ln3_g': lp['ln3_g'].reshape(1, D), 'ln3_b': lp['ln3_b'].reshape(1, D),
            'ffn_w1': lp['ffn_w1'], 'ffn_b1': lp['ffn_b1'].reshape(1, -1),
            'ffn_w2': lp['ffn_w2'], 'ffn_b2': lp['ffn_b2'].reshape(1, D)})
    return {'pe': raw['pe'],
            'embed_w': raw['embed_w'], 'embed_b': raw['embed_b'].reshape(1, D),
            'after_norm_g': raw['after_norm_g'].reshape(1, D),
            'after_norm_b': raw['after_norm_b'].reshape(1, D),
            'out_w': raw['out_w'], 'out_b': raw['out_b'].reshape(1, -1),
            'layers': layers}


# ---------------------------------- main --------------------------------------

if __name__ == "__main__":
    B, T, S = 2, 8, 12            # batch, maxlen_out, maxlen_in
    D, H, FF, V = 32, 4, 64, 16   # attention_dim, heads, linear_units, vocab_size
    num_blocks, r_num_blocks = 2, 1

    key = jax.random.PRNGKey(0)
    k_pl, k_pr, k_mem, k_ys, k_rys = jax.random.split(key, 5)

    params = {
        'left': fuse_decoder_params(init_raw_decoder_params(k_pl, num_blocks, V, D, H, FF), H),
        'right': fuse_decoder_params(init_raw_decoder_params(k_pr, r_num_blocks, V, D, H, FF), H),
    }

    memory = jax.random.normal(k_mem, (B, S, D), dtype=jnp.float32)
    memory_mask = jnp.ones((B, 1, S), dtype=bool).at[1, 0, 9:].set(False)
    # embed is Linear(vocab_size, D) -> float (B, T, vocab_size) inputs
    ys_in_pad = jax.random.normal(k_ys, (B, T, V), dtype=jnp.float32)
    r_ys_in_pad = jax.random.normal(k_rys, (B, T, V), dtype=jnp.float32)
    ys_in_lens = jnp.array([8, 6], dtype=jnp.int32)

    l_x, r_x, olens = bi_transformer_decoder_forward(
        params, memory, memory_mask, ys_in_pad, ys_in_lens, r_ys_in_pad,
        H=H, reverse_weight=0.3)

    jax.block_until_ready(l_x)
    jax.block_until_ready(r_x)
    assert l_x.shape == (B, T, V)
    assert r_x.shape == (B, T, V)
    assert bool(jnp.all(jnp.isfinite(l_x))) and bool(jnp.all(jnp.isfinite(r_x)))
    print("KERNEL_OK")
</pallas_src>

<mosaic_0001>
module attributes {stable_mosaic.version = 11 : i64} {
  func.func @_embed_kernel(%arg0: i32, %arg1: memref<1x8x16xf32, #tpu.memory_space<vmem>>, %arg2: memref<16x32xf32, #tpu.memory_space<vmem>>, %arg3: memref<1x32xf32, #tpu.memory_space<vmem>>, %arg4: memref<8x32xf32, #tpu.memory_space<vmem>>, %arg5: memref<1x8x32xf32, #tpu.memory_space<vmem>>) attributes {dimension_semantics = [#tpu.dimension_semantics<parallel>], iteration_bounds = array<i64: 2>, scalar_prefetch = 0 : i64, scratch_operands = 0 : i64, tpu.core_type = #tpu.core_type<tc>, window_params = [{transform_indices = @transform_0, window_bounds = array<i64: 1, 8, 16>}, {pipeline_mode = #tpu.pipeline_mode<synchronous>, transform_indices = @transform_1, window_bounds = array<i64: 16, 32>}, {pipeline_mode = #tpu.pipeline_mode<synchronous>, transform_indices = @transform_2, window_bounds = array<i64: 1, 32>}, {pipeline_mode = #tpu.pipeline_mode<synchronous>, transform_indices = @transform_3, window_bounds = array<i64: 8, 32>}, {transform_indices = @transform_4, window_bounds = array<i64: 1, 8, 32>}]} {
    %c0 = arith.constant 0 : index
    %c0_0 = arith.constant 0 : index
    %c0_1 = arith.constant 0 : index
    %0 = vector.load %arg1[%c0, %c0_0, %c0_1] : memref<1x8x16xf32, #tpu.memory_space<vmem>>, vector<1x8x16xf32>
    %1 = vector.shape_cast %0 : vector<1x8x16xf32> to vector<8x16xf32>
    %c0_2 = arith.constant 0 : index
    %c0_3 = arith.constant 0 : index
    %2 = vector.load %arg2[%c0_2, %c0_3] : memref<16x32xf32, #tpu.memory_space<vmem>>, vector<16x32xf32>
    %cst = arith.constant dense<0.000000e+00> : vector<8x32xf32>
    %3 = tpu.matmul %1, %2, %cst {dimension_numbers = #tpu.dot_dimension_numbers<[1], [0], [0], [1], [0, 0, 1, 1], [], []>} : vector<8x16xf32>, vector<16x32xf32>, vector<8x32xf32> -> vector<8x32xf32>
    %c0_4 = arith.constant 0 : index
    %c0_5 = arith.constant 0 : index
    %4 = vector.load %arg3[%c0_4, %c0_5] : memref<1x32xf32, #tpu.memory_space<vmem>>, vector<1x32xf32>
    %5 = vector.broadcast %4 : vector<1x32xf32> to vector<8x32xf32>
    %6 = arith.addf %3, %5 : vector<8x32xf32>
    %cst_6 = arith.constant 5.65685415 : f32
    %7 = vector.broadcast %cst_6 : f32 to vector<8x32xf32>
    %8 = arith.mulf %6, %7 : vector<8x32xf32>
    %c0_7 = arith.constant 0 : index
    %c0_8 = arith.constant 0 : index
    %9 = vector.load %arg4[%c0_7, %c0_8] : memref<8x32xf32, #tpu.memory_space<vmem>>, vector<8x32xf32>
    %10 = arith.addf %8, %9 : vector<8x32xf32>
    %c0_9 = arith.constant 0 : index
    %c0_10 = arith.constant 0 : index
    %c0_11 = arith.constant 0 : index
    %11 = vector.load %arg5[%c0_9, %c0_10, %c0_11] : memref<1x8x32xf32, #tpu.memory_space<vmem>>, vector<1x8x32xf32>
    %12 = vector.shape_cast %11 : vector<1x8x32xf32> to vector<8x32xf32>
    %13 = vector.shape_cast %10 : vector<8x32xf32> to vector<1x8x32xf32>
    tpu.vector_store %arg5[%c0_9, %c0_10, %c0_11], %13 {strides = array<i32>} : memref<1x8x32xf32, #tpu.memory_space<vmem>>, vector<1x8x32xf32>,
    return
  }
  func.func @transform_0(%arg0: i32) -> (i32, i32, i32) {
    %c0_i32 = arith.constant 0 : i32
    %c0_i32_0 = arith.constant 0 : i32
    %c0_i32_1 = arith.constant 0 : i32
    return %arg0, %c0_i32, %c0_i32_0 : i32, i32, i32
  }
  func.func @transform_1(%arg0: i32) -> (i32, i32) {
    %c0_i32 = arith.constant 0 : i32
    %c0_i32_0 = arith.constant 0 : i32
    %c0_i32_1 = arith.constant 0 : i32
    return %c0_i32, %c0_i32_0 : i32, i32
  }
  func.func @transform_2(%arg0: i32) -> (i32, i32) {
    %c0_i32 = arith.constant 0 : i32
    %c0_i32_0 = arith.constant 0 : i32
    %c0_i32_1 = arith.constant 0 : i32
    return %c0_i32, %c0_i32_0 : i32, i32
  }
  func.func @transform_3(%arg0: i32) -> (i32, i32) {
    %c0_i32 = arith.constant 0 : i32
    %c0_i32_0 = arith.constant 0 : i32
    %c0_i32_1 = arith.constant 0 : i32
    return %c0_i32, %c0_i32_0 : i32, i32
  }
  func.func @transform_4(%arg0: i32) -> (i32, i32, i32) {
    %c0_i32 = arith.constant 0 : i32
    %c0_i32_0 = arith.constant 0 : i32
    %c0_i32_1 = arith.constant 0 : i32
    return %arg0, %c0_i32, %c0_i32_0 : i32, i32, i32
  }
}

module attributes {stable_mosaic.version = 11 : i64} {
  func.func @_self_attn_block_kernel(%arg0: i32, %arg1: memref<1x8x32xf32, #tpu.memory_space<vmem>>, %arg2: memref<1x8x8xf32, #tpu.memory_space<vmem>>, %arg3: memref<1x32xf32, #tpu.memory_space<vmem>>, %arg4: memref<1x32xf32, #tpu.memory_space<vmem>>, %arg5: memref<32x96xf32, #tpu.memory_space<vmem>>, %arg6: memref<1x96xf32, #tpu.memory_space<vmem>>, %arg7: memref<32x32xf32, #tpu.memory_space<vmem>>, %arg8: memref<1x32xf32, #tpu.memory_space<vmem>>, %arg9: memref<1x8x32xf32, #tpu.memory_space<vmem>>) attributes {dimension_semantics = [#tpu.dimension_semantics<parallel>], iteration_bounds = array<i64: 2>, scalar_prefetch = 0 : i64, scratch_operands = 0 : i64, tpu.core_type = #tpu.core_type<tc>, window_params = [{transform_indices = @transform_0, window_bounds = array<i64: 1, 8, 32>}, {transform_indices = @transform_1, window_bounds = array<i64: 1, 8, 8>}, {pipeline_mode = #tpu.pipeline_mode<synchronous>, transform_indices = @transform_2, window_bounds = array<i64: 1, 32>}, {pipeline_mode = #tpu.pipeline_mode<synchronous>, transform_indices = @transform_3, window_bounds = array<i64: 1, 32>}, {pipeline_mode = #tpu.pipeline_mode<synchronous>, transform_indices = @transform_4, window_bounds = array<i64: 32, 96>}, {pipeline_mode = #tpu.pipeline_mode<synchronous>, transform_indices = @transform_5, window_bounds = array<i64: 1, 96>}, {pipeline_mode = #tpu.pipeline_mode<synchronous>, transform_indices = @transform_6, window_bounds = array<i64: 32, 32>}, {pipeline_mode = #tpu.pipeline_mode<synchronous>, transform_indices = @transform_7, window_bounds = array<i64: 1, 32>}, {transform_indices = @transform_8, window_bounds = array<i64: 1, 8, 32>}]} {
    %c0 = arith.constant 0 : index
    %c0_0 = arith.constant 0 : index
    %c0_1 = arith.constant 0 : index
    %0 = vector.load %arg1[%c0, %c0_0, %c0_1] : memref<1x8x32xf32, #tpu.memory_space<vmem>>, vector<1x8x32xf32>
    %1 = vector.shape_cast %0 : vector<1x8x32xf32> to vector<8x32xf32>
    %c0_2 = arith.constant 0 : index
    %c0_3 = arith.constant 0 : index
    %2 = vector.load %arg3[%c0_2, %c0_3] : memref<1x32xf32, #tpu.memory_space<vmem>>, vector<1x32xf32>
    %c0_4 = arith.constant 0 : index
    %c0_5 = arith.constant 0 : index
    %3 = vector.load %arg4[%c0_4, %c0_5] : memref<1x32xf32, #tpu.memory_space<vmem>>, vector<1x32xf32>
    %cst = arith.constant dense<0.000000e+00> : vector<8xf32>
    %4 = vector.multi_reduction <add>, %1, %cst [1] : vector<8x32xf32> to vector<8xf32>
    %5 = vector.shape_cast %4 : vector<8xf32> to vector<8x1xf32>
    %cst_6 = arith.constant 3.200000e+01 : f32
    %6 = vector.broadcast %cst_6 : f32 to vector<8x1xf32>
    %7 = arith.divf %5, %6 : vector<8x1xf32>
    %8 = vector.broadcast %7 : vector<8x1xf32> to vector<8x32xf32>
    %9 = arith.subf %1, %8 : vector<8x32xf32>
    %10 = arith.mulf %9, %9 : vector<8x32xf32>
    %cst_7 = arith.constant dense<0.000000e+00> : vector<8xf32>
    %11 = vector.multi_reduction <add>, %10, %cst_7 [1] : vector<8x32xf32> to vector<8xf32>
    %12 = vector.shape_cast %11 : vector<8xf32> to vector<8x1xf32>
    %cst_8 = arith.constant 3.200000e+01 : f32
    %13 = vector.broadcast %cst_8 : f32 to vector<8x1xf32>
    %14 = arith.divf %12, %13 : vector<8x1xf32>
    %15 = vector.broadcast %7 : vector<8x1xf32> to vector<8x32xf32>
    %16 = arith.subf %1, %15 : vector<8x32xf32>
    %cst_9 = arith.constant 9.99999974E-6 : f32
    %17 = vector.broadcast %cst_9 : f32 to vector<8x1xf32>
    %18 = arith.addf %14, %17 : vector<8x1xf32>
    %19 = math.rsqrt %18 : vector<8x1xf32>
    %20 = vector.broadcast %19 : vector<8x1xf32> to vector<8x32xf32>
    %21 = arith.mulf %16, %20 : vector<8x32xf32>
    %22 = vector.broadcast %2 : vector<1x32xf32> to vector<8x32xf32>
    %23 = arith.mulf %21, %22 : vector<8x32xf32>
    %24 = vector.broadcast %3 : vector<1x32xf32> to vector<8x32xf32>
    %25 = arith.addf %23, %24 : vector<8x32xf32>
    %c0_10 = arith.constant 0 : index
    %c0_11 = arith.constant 0 : index
    %26 = vector.load %arg5[%c0_10, %c0_11] : memref<32x96xf32, #tpu.memory_space<vmem>>, vector<32x96xf32>
    %cst_12 = arith.constant dense<0.000000e+00> : vector<8x96xf32>
    %27 = tpu.matmul %25, %26, %cst_12 {dimension_numbers = #tpu.dot_dimension_numbers<[1], [0], [0], [1], [0, 0, 1, 1], [], []>} : vector<8x32xf32>, vector<32x96xf32>, vector<8x96xf32> -> vector<8x96xf32>
    %c0_13 = arith.constant 0 : index
    %c0_14 = arith.constant 0 : index
    %28 = vector.load %arg6[%c0_13, %c0_14] : memref<1x96xf32, #tpu.memory_space<vmem>>, vector<1x96xf32>
    %29 = vector.broadcast %28 : vector<1x96xf32> to vector<8x96xf32>
    %30 = arith.addf %27, %29 : vector<8x96xf32>
    %c0_15 = arith.constant 0 : index
    %c0_16 = arith.constant 0 : index
    %c0_17 = arith.constant 0 : index
    %31 = vector.load %arg2[%c0_15, %c0_16, %c0_17] : memref<1x8x8xf32, #tpu.memory_space<vmem>>, vector<1x8x8xf32>
    %32 = vector.shape_cast %31 : vector<1x8x8xf32> to vector<8x8xf32>
    %c0_18 = arith.constant 0 : index
    %c0_19 = arith.constant 0 : index
    %33 = vector.load %arg7[%c0_18, %c0_19] : memref<32x32xf32, #tpu.memory_space<vmem>>, vector<32x32xf32>
    %cst_20 = arith.constant 0.000000e+00 : f32
    %34 = vector.broadcast %cst_20 : f32 to vector<8x32xf32>
    %35 = vector.extract_strided_slice %30 {offsets = [0, 0], sizes = [8, 8], strides = [1, 1]} : vector<8x96xf32> to vector<8x8xf32>
    %36 = vector.extract_strided_slice %30 {offsets = [0, 32], sizes = [8, 8], strides = [1, 1]} : vector<8x96xf32> to vector<8x8xf32>
    %37 = vector.extract_strided_slice %30 {offsets = [0, 64], sizes = [8, 8], strides = [1, 1]} : vector<8x96xf32> to vector<8x8xf32>
    %cst_21 = arith.constant dense<0.000000e+00> : vector<8x8xf32>
    %38 = tpu.matmul %35, %36, %cst_21 {dimension_numbers = #tpu.dot_dimension_numbers<[1], [1], [0], [0], [0, 0, 1, 0], [], []>} : vector<8x8xf32>, vector<8x8xf32>, vector<8x8xf32> -> vector<8x8xf32>
    %cst_22 = arith.constant 0.000000e+00 : f32
    %39 = vector.broadcast %cst_22 : f32 to vector<8x8xf32>
    %40 = arith.cmpf ogt, %32, %39 : vector<8x8xf32>
    %cst_23 = arith.constant -3.40282347E+38 : f32
    %41 = vector.broadcast %cst_23 : f32 to vector<8x8xf32>
    %42 = arith.select %40, %38, %41 : vector<8x8xi1>, vector<8x8xf32>
    %cst_24 = arith.constant dense<0xFF800000> : vector<8xf32>
    %43 = vector.multi_reduction <maximumf>, %42, %cst_24 [1] : vector<8x8xf32> to vector<8xf32>
    %44 = vector.shape_cast %43 : vector<8xf32> to vector<8x1xf32>
    %45 = vector.broadcast %44 : vector<8x1xf32> to vector<8x8xf32>
    %46 = arith.subf %42, %45 : vector<8x8xf32>
    %47 = math.exp %46 : vector<8x8xf32>
    %cst_25 = arith.constant dense<0.000000e+00> : vector<8xf32>
    %48 = vector.multi_reduction <add>, %47, %cst_25 [1] : vector<8x8xf32> to vector<8xf32>
    %49 = vector.shape_cast %48 : vector<8xf32> to vector<8x1xf32>
    %50 = tpu.reciprocal %49 {approx = true} : vector<8x1xf32> -> vector<8x1xf32>
    %51 = vector.broadcast %50 : vector<8x1xf32> to vector<8x8xf32>
    %52 = arith.mulf %47, %51 : vector<8x8xf32>
    %cst_26 = arith.constant 0.000000e+00 : f32
    %53 = vector.broadcast %cst_26 : f32 to vector<8x8xf32>
    %54 = arith.cmpf ogt, %32, %53 : vector<8x8xf32>
    %cst_27 = arith.constant 0.000000e+00 : f32
    %55 = vector.broadcast %cst_27 : f32 to vector<8x8xf32>
    %56 = arith.select %54, %52, %55 : vector<8x8xi1>, vector<8x8xf32>
    %cst_28 = arith.constant dense<0.000000e+00> : vector<8x8xf32>
    %57 = tpu.matmul %56, %37, %cst_28 {dimension_numbers = #tpu.dot_dimension_numbers<[1], [0], [0], [1], [0, 0, 1, 1], [], []>} : vector<8x8xf32>, vector<8x8xf32>, vector<8x8xf32> -> vector<8x8xf32>
    %58 = vector.extract_strided_slice %33 {offsets = [0, 0], sizes = [8, 32], strides = [1, 1]} : vector<32x32xf32> to vector<8x32xf32>
    %cst_29 = arith.constant dense<0.000000e+00> : vector<8x32xf32>
    %59 = tpu.matmul %57, %58, %cst_29 {dimension_numbers = #tpu.dot_dimension_numbers<[1], [0], [0], [1], [0, 0, 1, 1], [], []>} : vector<8x8xf32>, vector<8x32xf32>, vector<8x32xf32> -> vector<8x32xf32>
    %60 = arith.addf %34, %59 : vector<8x32xf32>
    %61 = vector.extract_strided_slice %30 {offsets = [0, 8], sizes = [8, 8], strides = [1, 1]} : vector<8x96xf32> to vector<8x8xf32>
    %62 = vector.extract_strided_slice %30 {offsets = [0, 40], sizes = [8, 8], strides = [1, 1]} : vector<8x96xf32> to vector<8x8xf32>
    %63 = vector.extract_strided_slice %30 {offsets = [0, 72], sizes = [8, 8], strides = [1, 1]} : vector<8x96xf32> to vector<8x8xf32>
    %cst_30 = arith.constant dense<0.000000e+00> : vector<8x8xf32>
    %64 = tpu.matmul %61, %62, %cst_30 {dimension_numbers = #tpu.dot_dimension_numbers<[1], [1], [0], [0], [0, 0, 1, 0], [], []>} : vector<8x8xf32>, vector<8x8xf32>, vector<8x8xf32> -> vector<8x8xf32>
    %cst_31 = arith.constant 0.000000e+00 : f32
    %65 = vector.broadcast %cst_31 : f32 to vector<8x8xf32>
    %66 = arith.cmpf ogt, %32, %65 : vector<8x8xf32>
    %cst_32 = arith.constant -3.40282347E+38 : f32
    %67 = vector.broadcast %cst_32 : f32 to vector<8x8xf32>
    %68 = arith.select %66, %64, %67 : vector<8x8xi1>, vector<8x8xf32>
    %cst_33 = arith.constant dense<0xFF800000> : vector<8xf32>
    %69 = vector.multi_reduction <maximumf>, %68, %cst_33 [1] : vector<8x8xf32> to vector<8xf32>
    %70 = vector.shape_cast %69 : vector<8xf32> to vector<8x1xf32>
    %71 = vector.broadcast %70 : vector<8x1xf32> to vector<8x8xf32>
    %72 = arith.subf %68, %71 : vector<8x8xf32>
    %73 = math.exp %72 : vector<8x8xf32>
    %cst_34 = arith.constant dense<0.000000e+00> : vector<8xf32>
    %74 = vector.multi_reduction <add>, %73, %cst_34 [1] : vector<8x8xf32> to vector<8xf32>
    %75 = vector.shape_cast %74 : vector<8xf32> to vector<8x1xf32>
    %76 = tpu.reciprocal %75 {approx = true} : vector<8x1xf32> -> vector<8x1xf32>
    %77 = vector.broadcast %76 : vector<8x1xf32> to vector<8x8xf32>
    %78 = arith.mulf %73, %77 : vector<8x8xf32>
    %cst_35 = arith.constant 0.000000e+00 : f32
    %79 = vector.broadcast %cst_35 : f32 to vector<8x8xf32>
    %80 = arith.cmpf ogt, %32, %79 : vector<8x8xf32>
    %cst_36 = arith.constant 0.000000e+00 : f32
    %81 = vector.broadcast %cst_36 : f32 to vector<8x8xf32>
    %82 = arith.select %80, %78, %81 : vector<8x8xi1>, vector<8x8xf32>
    %cst_37 = arith.constant dense<0.000000e+00> : vector<8x8xf32>
    %83 = tpu.matmul %82, %63, %cst_37 {dimension_numbers = #tpu.dot_dimension_numbers<[1], [0], [0], [1], [0, 0, 1, 1], [], []>} : vector<8x8xf32>, vector<8x8xf32>, vector<8x8xf32> -> vector<8x8xf32>
    %84 = vector.extract_strided_slice %33 {offsets = [8, 0], sizes = [8, 32], strides = [1, 1]} : vector<32x32xf32> to vector<8x32xf32>
    %cst_38 = arith.constant dense<0.000000e+00> : vector<8x32xf32>
    %85 = tpu.matmul %83, %84, %cst_38 {dimension_numbers = #tpu.dot_dimension_numbers<[1], [0], [0], [1], [0, 0, 1, 1], [], []>} : vector<8x8xf32>, vector<8x32xf32>, vector<8x32xf32> -> vector<8x32xf32>
    %86 = arith.addf %60, %85 : vector<8x32xf32>
    %87 = vector.extract_strided_slice %30 {offsets = [0, 16], sizes = [8, 8], strides = [1, 1]} : vector<8x96xf32> to vector<8x8xf32>
    %88 = vector.extract_strided_slice %30 {offsets = [0, 48], sizes = [8, 8], strides = [1, 1]} : vector<8x96xf32> to vector<8x8xf32>
    %89 = vector.extract_strided_slice %30 {offsets = [0, 80], sizes = [8, 8], strides = [1, 1]} : vector<8x96xf32> to vector<8x8xf32>
    %cst_39 = arith.constant dense<0.000000e+00> : vector<8x8xf32>
    %90 = tpu.matmul %87, %88, %cst_39 {dimension_numbers = #tpu.dot_dimension_numbers<[1], [1], [0], [0], [0, 0, 1, 0], [], []>} : vector<8x8xf32>, vector<8x8xf32>, vector<8x8xf32> -> vector<8x8xf32>
    %cst_40 = arith.constant 0.000000e+00 : f32
    %91 = vector.broadcast %cst_40 : f32 to vector<8x8xf32>
    %92 = arith.cmpf ogt, %32, %91 : vector<8x8xf32>
    %cst_41 = arith.constant -3.40282347E+38 : f32
    %93 = vector.broadcast %cst_41 : f32 to vector<8x8xf32>
    %94 = arith.select %92, %90, %93 : vector<8x8xi1>, vector<8x8xf32>
    %cst_42 = arith.constant dense<0xFF800000> : vector<8xf32>
    %95 = vector.multi_reduction <maximumf>, %94, %cst_42 [1] : vector<8x8xf32> to vector<8xf32>
    %96 = vector.shape_cast %95 : vector<8xf32> to vector<8x1xf32>
    %97 = vector.broadcast %96 : vector<8x1xf32> to vector<8x8xf32>
    %98 = arith.subf %94, %97 : vector<8x8xf32>
    %99 = math.exp %98 : vector<8x8xf32>
    %cst_43 = arith.constant dense<0.000000e+00> : vector<8xf32>
    %100 = vector.multi_reduction <add>, %99, %cst_43 [1] : vector<8x8xf32> to vector<8xf32>
    %101 = vector.shape_cast %100 : vector<8xf32> to vector<8x1xf32>
    %102 = tpu.reciprocal %101 {approx = true} : vector<8x1xf32> -> vector<8x1xf32>
    %103 = vector.broadcast %102 : vector<8x1xf32> to vector<8x8xf32>
    %104 = arith.mulf %99, %103 : vector<8x8xf32>
    %cst_44 = arith.constant 0.000000e+00 : f32
    %105 = vector.broadcast %cst_44 : f32 to vector<8x8xf32>
    %106 = arith.cmpf ogt, %32, %105 : vector<8x8xf32>
    %cst_45 = arith.constant 0.000000e+00 : f32
    %107 = vector.broadcast %cst_45 : f32 to vector<8x8xf32>
    %108 = arith.select %106, %104, %107 : vector<8x8xi1>, vector<8x8xf32>
    %cst_46 = arith.constant dense<0.000000e+00> : vector<8x8xf32>
    %109 = tpu.matmul %108, %89, %cst_46 {dimension_numbers = #tpu.dot_dimension_numbers<[1], [0], [0], [1], [0, 0, 1, 1], [], []>} : vector<8x8xf32>, vector<8x8xf32>, vector<8x8xf32> -> vector<8x8xf32>
    %110 = vector.extract_strided_slice %33 {offsets = [16, 0], sizes = [8, 32], strides = [1, 1]} : vector<32x32xf32> to vector<8x32xf32>
    %cst_47 = arith.constant dense<0.000000e+00> : vector<8x32xf32>
    %111 = tpu.matmul %109, %110, %cst_47 {dimension_numbers = #tpu.dot_dimension_numbers<[1], [0], [0], [1], [0, 0, 1, 1], [], []>} : vector<8x8xf32>, vector<8x32xf32>, vector<8x32xf32> -> vector<8x32xf32>
    %112 = arith.addf %86, %111 : vector<8x32xf32>
    %113 = vector.extract_strided_slice %30 {offsets = [0, 24], sizes = [8, 8], strides = [1, 1]} : vector<8x96xf32> to vector<8x8xf32>
    %114 = vector.extract_strided_slice %30 {offsets = [0, 56], sizes = [8, 8], strides = [1, 1]} : vector<8x96xf32> to vector<8x8xf32>
    %115 = vector.extract_strided_slice %30 {offsets = [0, 88], sizes = [8, 8], strides = [1, 1]} : vector<8x96xf32> to vector<8x8xf32>
    %cst_48 = arith.constant dense<0.000000e+00> : vector<8x8xf32>
    %116 = tpu.matmul %113, %114, %cst_48 {dimension_numbers = #tpu.dot_dimension_numbers<[1], [1], [0], [0], [0, 0, 1, 0], [], []>} : vector<8x8xf32>, vector<8x8xf32>, vector<8x8xf32> -> vector<8x8xf32>
    %cst_49 = arith.constant 0.000000e+00 : f32
    %117 = vector.broadcast %cst_49 : f32 to vector<8x8xf32>
    %118 = arith.cmpf ogt, %32, %117 : vector<8x8xf32>
    %cst_50 = arith.constant -3.40282347E+38 : f32
    %119 = vector.broadcast %cst_50 : f32 to vector<8x8xf32>
    %120 = arith.select %118, %116, %119 : vector<8x8xi1>, vector<8x8xf32>
    %cst_51 = arith.constant dense<0xFF800000> : vector<8xf32>
    %121 = vector.multi_reduction <maximumf>, %120, %cst_51 [1] : vector<8x8xf32> to vector<8xf32>
    %122 = vector.shape_cast %121 : vector<8xf32> to vector<8x1xf32>
    %123 = vector.broadcast %122 : vector<8x1xf32> to vector<8x8xf32>
    %124 = arith.subf %120, %123 : vector<8x8xf32>
    %125 = math.exp %124 : vector<8x8xf32>
    %cst_52 = arith.constant dense<0.000000e+00> : vector<8xf32>
    %126 = vector.multi_reduction <add>, %125, %cst_52 [1] : vector<8x8xf32> to vector<8xf32>
    %127 = vector.shape_cast %126 : vector<8xf32> to vector<8x1xf32>
    %128 = tpu.reciprocal %127 {approx = true} : vector<8x1xf32> -> vector<8x1xf32>
    %129 = vector.broadcast %128 : vector<8x1xf32> to vector<8x8xf32>
    %130 = arith.mulf %125, %129 : vector<8x8xf32>
    %cst_53 = arith.constant 0.000000e+00 : f32
    %131 = vector.broadcast %cst_53 : f32 to vector<8x8xf32>
    %132 = arith.cmpf ogt, %32, %131 : vector<8x8xf32>
    %cst_54 = arith.constant 0.000000e+00 : f32
    %133 = vector.broadcast %cst_54 : f32 to vector<8x8xf32>
    %134 = arith.select %132, %130, %133 : vector<8x8xi1>, vector<8x8xf32>
    %cst_55 = arith.constant dense<0.000000e+00> : vector<8x8xf32>
    %135 = tpu.matmul %134, %115, %cst_55 {dimension_numbers = #tpu.dot_dimension_numbers<[1], [0], [0], [1], [0, 0, 1, 1], [], []>} : vector<8x8xf32>, vector<8x8xf32>, vector<8x8xf32> -> vector<8x8xf32>
    %136 = vector.extract_strided_slice %33 {offsets = [24, 0], sizes = [8, 32], strides = [1, 1]} : vector<32x32xf32> to vector<8x32xf32>
    %cst_56 = arith.constant dense<0.000000e+00> : vector<8x32xf32>
    %137 = tpu.matmul %135, %136, %cst_56 {dimension_numbers = #tpu.dot_dimension_numbers<[1], [0], [0], [1], [0, 0, 1, 1], [], []>} : vector<8x8xf32>, vector<8x32xf32>, vector<8x32xf32> -> vector<8x32xf32>
    %138 = arith.addf %112, %137 : vector<8x32xf32>
    %139 = arith.addf %1, %138 : vector<8x32xf32>
    %c0_57 = arith.constant 0 : index
    %c0_58 = arith.constant 0 : index
    %140 = vector.load %arg8[%c0_57, %c0_58] : memref<1x32xf32, #tpu.memory_space<vmem>>, vector<1x32xf32>
    %141 = vector.broadcast %140 : vector<1x32xf32> to vector<8x32xf32>
    %142 = arith.addf %139, %141 : vector<8x32xf32>
    %c0_59 = arith.constant 0 : index
    %c0_60 = arith.constant 0 : index
    %c0_61 = arith.constant 0 : index
    %143 = vector.load %arg9[%c0_59, %c0_60, %c0_61] : memref<1x8x32xf32, #tpu.memory_space<vmem>>, vector<1x8x32xf32>
    %144 = vector.shape_cast %143 : vector<1x8x32xf32> to vector<8x32xf32>
    %145 = vector.shape_cast %142 : vector<8x32xf32> to vector<1x8x32xf32>
    tpu.vector_store %arg9[%c0_59, %c0_60, %c0_61], %145 {strides = array<i32>} : memref<1x8x32xf32, #tpu.memory_space<vmem>>, vector<1x8x32xf32>,
    return
  }
  func.func @transform_0(%arg0: i32) -> (i32, i32, i32) {
    %c0_i32 = arith.constant 0 : i32
    %c0_i32_0 = arith.constant 0 : i32
    %c0_i32_1 = arith.constant 0 : i32
    return %arg0, %c0_i32, %c0_i32_0 : i32, i32, i32
  }
  func.func @transform_1(%arg0: i32) -> (i32, i32, i32) {
    %c0_i32 = arith.constant 0 : i32
    %c0_i32_0 = arith.constant 0 : i32
    %c0_i32_1 = arith.constant 0 : i32
    return %arg0, %c0_i32, %c0_i32_0 : i32, i32, i32
  }
  func.func @transform_2(%arg0: i32) -> (i32, i32) {
    %c0_i32 = arith.constant 0 : i32
    %c0_i32_0 = arith.constant 0 : i32
    %c0_i32_1 = arith.constant 0 : i32
    return %c0_i32, %c0_i32_0 : i32, i32
  }
  func.func @transform_3(%arg0: i32) -> (i32, i32) {
    %c0_i32 = arith.constant 0 : i32
    %c0_i32_0 = arith.constant 0 : i32
    %c0_i32_1 = arith.constant 0 : i32
    return %c0_i32, %c0_i32_0 : i32, i32
  }
  func.func @transform_4(%arg0: i32) -> (i32, i32) {
    %c0_i32 = arith.constant 0 : i32
    %c0_i32_0 = arith.constant 0 : i32
    %c0_i32_1 = arith.constant 0 : i32
    return %c0_i32, %c0_i32_0 : i32, i32
  }
  func.func @transform_5(%arg0: i32) -> (i32, i32) {
    %c0_i32 = arith.constant 0 : i32
    %c0_i32_0 = arith.constant 0 : i32
    %c0_i32_1 = arith.constant 0 : i32
    return %c0_i32, %c0_i32_0 : i32, i32
  }
  func.func @transform_6(%arg0: i32) -> (i32, i32) {
    %c0_i32 = arith.constant 0 : i32
    %c0_i32_0 = arith.constant 0 : i32
    %c0_i32_1 = arith.constant 0 : i32
    return %c0_i32, %c0_i32_0 : i32, i32
  }
  func.func @transform_7(%arg0: i32) -> (i32, i32) {
    %c0_i32 = arith.constant 0 : i32
    %c0_i32_0 = arith.constant 0 : i32
    %c0_i32_1 = arith.constant 0 : i32
    return %c0_i32, %c0_i32_0 : i32, i32
  }
  func.func @transform_8(%arg0: i32) -> (i32, i32, i32) {
    %c0_i32 = arith.constant 0 : i32
    %c0_i32_0 = arith.constant 0 : i32
    %c0_i32_1 = arith.constant 0 : i32
    return %arg0, %c0_i32, %c0_i32_0 : i32, i32, i32
  }
}

module attributes {stable_mosaic.version = 11 : i64} {
  func.func @_cross_attn_block_kernel(%arg0: i32, %arg1: memref<1x8x32xf32, #tpu.memory_space<vmem>>, %arg2: memref<1x12x32xf32, #tpu.memory_space<vmem>>, %arg3: memref<1x1x12xf32, #tpu.memory_space<vmem>>, %arg4: memref<1x32xf32, #tpu.memory_space<vmem>>, %arg5: memref<1x32xf32, #tpu.memory_space<vmem>>, %arg6: memref<32x32xf32, #tpu.memory_space<vmem>>, %arg7: memref<1x32xf32, #tpu.memory_space<vmem>>, %arg8: memref<32x64xf32, #tpu.memory_space<vmem>>, %arg9: memref<1x64xf32, #tpu.memory_space<vmem>>, %arg10: memref<32x32xf32, #tpu.memory_space<vmem>>, %arg11: memref<1x32xf32, #tpu.memory_space<vmem>>, %arg12: memref<1x8x32xf32, #tpu.memory_space<vmem>>) attributes {dimension_semantics = [#tpu.dimension_semantics<parallel>], iteration_bounds = array<i64: 2>, scalar_prefetch = 0 : i64, scratch_operands = 0 : i64, tpu.core_type = #tpu.core_type<tc>, window_params = [{transform_indices = @transform_0, window_bounds = array<i64: 1, 8, 32>}, {transform_indices = @transform_1, window_bounds = array<i64: 1, 12, 32>}, {transform_indices = @transform_2, window_bounds = array<i64: 1, 1, 12>}, {pipeline_mode = #tpu.pipeline_mode<synchronous>, transform_indices = @transform_3, window_bounds = array<i64: 1, 32>}, {pipeline_mode = #tpu.pipeline_mode<synchronous>, transform_indices = @transform_4, window_bounds = array<i64: 1, 32>}, {pipeline_mode = #tpu.pipeline_mode<synchronous>, transform_indices = @transform_5, window_bounds = array<i64: 32, 32>}, {pipeline_mode = #tpu.pipeline_mode<synchronous>, transform_indices = @transform_6, window_bounds = array<i64: 1, 32>}, {pipeline_mode = #tpu.pipeline_mode<synchronous>, transform_indices = @transform_7, window_bounds = array<i64: 32, 64>}, {pipeline_mode = #tpu.pipeline_mode<synchronous>, transform_indices = @transform_8, window_bounds = array<i64: 1, 64>}, {pipeline_mode = #tpu.pipeline_mode<synchronous>, transform_indices = @transform_9, window_bounds = array<i64: 32, 32>}, {pipeline_mode = #tpu.pipeline_mode<synchronous>, transform_indices = @transform_10, window_bounds = array<i64: 1, 32>}, {transform_indices = @transform_11, window_bounds = array<i64: 1, 8, 32>}]} {
    %c0 = arith.constant 0 : index
    %c0_0 = arith.constant 0 : index
    %c0_1 = arith.constant 0 : index
    %0 = vector.load %arg1[%c0, %c0_0, %c0_1] : memref<1x8x32xf32, #tpu.memory_space<vmem>>, vector<1x8x32xf32>
    %1 = vector.shape_cast %0 : vector<1x8x32xf32> to vector<8x32xf32>
    %c0_2 = arith.constant 0 : index
    %c0_3 = arith.constant 0 : index
    %c0_4 = arith.constant 0 : index
    %2 = vector.load %arg2[%c0_2, %c0_3, %c0_4] : memref<1x12x32xf32, #tpu.memory_space<vmem>>, vector<1x12x32xf32>
    %3 = vector.shape_cast %2 : vector<1x12x32xf32> to vector<12x32xf32>
    %c0_5 = arith.constant 0 : index
    %c0_6 = arith.constant 0 : index
    %4 = vector.load %arg4[%c0_5, %c0_6] : memref<1x32xf32, #tpu.memory_space<vmem>>, vector<1x32xf32>
    %c0_7 = arith.constant 0 : index
    %c0_8 = arith.constant 0 : index
    %5 = vector.load %arg5[%c0_7, %c0_8] : memref<1x32xf32, #tpu.memory_space<vmem>>, vector<1x32xf32>
    %cst = arith.constant dense<0.000000e+00> : vector<8xf32>
    %6 = vector.multi_reduction <add>, %1, %cst [1] : vector<8x32xf32> to vector<8xf32>
    %7 = vector.shape_cast %6 : vector<8xf32> to vector<8x1xf32>
    %cst_9 = arith.constant 3.200000e+01 : f32
    %8 = vector.broadcast %cst_9 : f32 to vector<8x1xf32>
    %9 = arith.divf %7, %8 : vector<8x1xf32>
    %10 = vector.broadcast %9 : vector<8x1xf32> to vector<8x32xf32>
    %11 = arith.subf %1, %10 : vector<8x32xf32>
    %12 = arith.mulf %11, %11 : vector<8x32xf32>
    %cst_10 = arith.constant dense<0.000000e+00> : vector<8xf32>
    %13 = vector.multi_reduction <add>, %12, %cst_10 [1] : vector<8x32xf32> to vector<8xf32>
    %14 = vector.shape_cast %13 : vector<8xf32> to vector<8x1xf32>
    %cst_11 = arith.constant 3.200000e+01 : f32
    %15 = vector.broadcast %cst_11 : f32 to vector<8x1xf32>
    %16 = arith.divf %14, %15 : vector<8x1xf32>
    %17 = vector.broadcast %9 : vector<8x1xf32> to vector<8x32xf32>
    %18 = arith.subf %1, %17 : vector<8x32xf32>
    %cst_12 = arith.constant 9.99999974E-6 : f32
    %19 = vector.broadcast %cst_12 : f32 to vector<8x1xf32>
    %20 = arith.addf %16, %19 : vector<8x1xf32>
    %21 = math.rsqrt %20 : vector<8x1xf32>
    %22 = vector.broadcast %21 : vector<8x1xf32> to vector<8x32xf32>
    %23 = arith.mulf %18, %22 : vector<8x32xf32>
    %24 = vector.broadcast %4 : vector<1x32xf32> to vector<8x32xf32>
    %25 = arith.mulf %23, %24 : vector<8x32xf32>
    %26 = vector.broadcast %5 : vector<1x32xf32> to vector<8x32xf32>
    %27 = arith.addf %25, %26 : vector<8x32xf32>
    %c0_13 = arith.constant 0 : index
    %c0_14 = arith.constant 0 : index
    %28 = vector.load %arg6[%c0_13, %c0_14] : memref<32x32xf32, #tpu.memory_space<vmem>>, vector<32x32xf32>
    %cst_15 = arith.constant dense<0.000000e+00> : vector<8x32xf32>
    %29 = tpu.matmul %27, %28, %cst_15 {dimension_numbers = #tpu.dot_dimension_numbers<[1], [0], [0], [1], [0, 0, 1, 1], [], []>} : vector<8x32xf32>, vector<32x32xf32>, vector<8x32xf32> -> vector<8x32xf32>
    %c0_16 = arith.constant 0 : index
    %c0_17 = arith.constant 0 : index
    %30 = vector.load %arg7[%c0_16, %c0_17] : memref<1x32xf32, #tpu.memory_space<vmem>>, vector<1x32xf32>
    %31 = vector.broadcast %30 : vector<1x32xf32> to vector<8x32xf32>
    %32 = arith.addf %29, %31 : vector<8x32xf32>
    %c0_18 = arith.constant 0 : index
    %c0_19 = arith.constant 0 : index
    %33 = vector.load %arg8[%c0_18, %c0_19] : memref<32x64xf32, #tpu.memory_space<vmem>>, vector<32x64xf32>
    %cst_20 = arith.constant dense<0.000000e+00> : vector<12x64xf32>
    %34 = tpu.matmul %3, %33, %cst_20 {dimension_numbers = #tpu.dot_dimension_numbers<[1], [0], [0], [1], [0, 0, 1, 1], [], []>} : vector<12x32xf32>, vector<32x64xf32>, vector<12x64xf32> -> vector<12x64xf32>
    %c0_21 = arith.constant 0 : index
    %c0_22 = arith.constant 0 : index
    %35 = vector.load %arg9[%c0_21, %c0_22] : memref<1x64xf32, #tpu.memory_space<vmem>>, vector<1x64xf32>
    %36 = vector.broadcast %35 : vector<1x64xf32> to vector<12x64xf32>
    %37 = arith.addf %34, %36 : vector<12x64xf32>
    %c0_23 = arith.constant 0 : index
    %c0_24 = arith.constant 0 : index
    %c0_25 = arith.constant 0 : index
    %38 = vector.load %arg3[%c0_23, %c0_24, %c0_25] : memref<1x1x12xf32, #tpu.memory_space<vmem>>, vector<1x1x12xf32>
    %39 = vector.shape_cast %38 : vector<1x1x12xf32> to vector<1x12xf32>
    %c0_26 = arith.constant 0 : index
    %c0_27 = arith.constant 0 : index
    %40 = vector.load %arg10[%c0_26, %c0_27] : memref<32x32xf32, #tpu.memory_space<vmem>>, vector<32x32xf32>
    %cst_28 = arith.constant 0.000000e+00 : f32
    %41 = vector.broadcast %cst_28 : f32 to vector<8x32xf32>
    %42 = vector.extract_strided_slice %32 {offsets = [0, 0], sizes = [8, 8], strides = [1, 1]} : vector<8x32xf32> to vector<8x8xf32>
    %43 = vector.extract_strided_slice %37 {offsets = [0, 0], sizes = [12, 8], strides = [1, 1]} : vector<12x64xf32> to vector<12x8xf32>
    %44 = vector.extract_strided_slice %37 {offsets = [0, 32], sizes = [12, 8], strides = [1, 1]} : vector<12x64xf32> to vector<12x8xf32>
    %cst_29 = arith.constant dense<0.000000e+00> : vector<8x12xf32>
    %45 = tpu.matmul %42, %43, %cst_29 {dimension_numbers = #tpu.dot_dimension_numbers<[1], [1], [0], [0], [0, 0, 1, 0], [], []>} : vector<8x8xf32>, vector<12x8xf32>, vector<8x12xf32> -> vector<8x12xf32>
    %cst_30 = arith.constant 0.000000e+00 : f32
    %46 = vector.broadcast %cst_30 : f32 to vector<1x12xf32>
    %47 = arith.cmpf ogt, %39, %46 : vector<1x12xf32>
    %cst_31 = arith.constant -3.40282347E+38 : f32
    %48 = vector.shape_cast %47 : vector<1x12xi1> to vector<1x12xi1>
    %49 = vector.broadcast %48 : vector<1x12xi1> to vector<8x12xi1>
    %50 = vector.broadcast %cst_31 : f32 to vector<8x12xf32>
    %51 = arith.select %49, %45, %50 : vector<8x12xi1>, vector<8x12xf32>
    %cst_32 = arith.constant dense<0xFF800000> : vector<8xf32>
    %52 = vector.multi_reduction <maximumf>, %51, %cst_32 [1] : vector<8x12xf32> to vector<8xf32>
    %53 = vector.shape_cast %52 : vector<8xf32> to vector<8x1xf32>
    %54 = vector.broadcast %53 : vector<8x1xf32> to vector<8x12xf32>
    %55 = arith.subf %51, %54 : vector<8x12xf32>
    %56 = math.exp %55 : vector<8x12xf32>
    %cst_33 = arith.constant dense<0.000000e+00> : vector<8xf32>
    %57 = vector.multi_reduction <add>, %56, %cst_33 [1] : vector<8x12xf32> to vector<8xf32>
    %58 = vector.shape_cast %57 : vector<8xf32> to vector<8x1xf32>
    %59 = tpu.reciprocal %58 {approx = true} : vector<8x1xf32> -> vector<8x1xf32>
    %60 = vector.broadcast %59 : vector<8x1xf32> to vector<8x12xf32>
    %61 = arith.mulf %56, %60 : vector<8x12xf32>
    %cst_34 = arith.constant 0.000000e+00 : f32
    %62 = vector.broadcast %cst_34 : f32 to vector<1x12xf32>
    %63 = arith.cmpf ogt, %39, %62 : vector<1x12xf32>
    %cst_35 = arith.constant 0.000000e+00 : f32
    %64 = vector.shape_cast %63 : vector<1x12xi1> to vector<1x12xi1>
    %65 = vector.broadcast %64 : vector<1x12xi1> to vector<8x12xi1>
    %66 = vector.broadcast %cst_35 : f32 to vector<8x12xf32>
    %67 = arith.select %65, %61, %66 : vector<8x12xi1>, vector<8x12xf32>
    %cst_36 = arith.constant dense<0.000000e+00> : vector<8x8xf32>
    %68 = tpu.matmul %67, %44, %cst_36 {dimension_numbers = #tpu.dot_dimension_numbers<[1], [0], [0], [1], [0, 0, 1, 1], [], []>} : vector<8x12xf32>, vector<12x8xf32>, vector<8x8xf32> -> vector<8x8xf32>
    %69 = vector.extract_strided_slice %40 {offsets = [0, 0], sizes = [8, 32], strides = [1, 1]} : vector<32x32xf32> to vector<8x32xf32>
    %cst_37 = arith.constant dense<0.000000e+00> : vector<8x32xf32>
    %70 = tpu.matmul %68, %69, %cst_37 {dimension_numbers = #tpu.dot_dimension_numbers<[1], [0], [0], [1], [0, 0, 1, 1], [], []>} : vector<8x8xf32>, vector<8x32xf32>, vector<8x32xf32> -> vector<8x32xf32>
    %71 = arith.addf %41, %70 : vector<8x32xf32>
    %72 = vector.extract_strided_slice %32 {offsets = [0, 8], sizes = [8, 8], strides = [1, 1]} : vector<8x32xf32> to vector<8x8xf32>
    %73 = vector.extract_strided_slice %37 {offsets = [0, 8], sizes = [12, 8], strides = [1, 1]} : vector<12x64xf32> to vector<12x8xf32>
    %74 = vector.extract_strided_slice %37 {offsets = [0, 40], sizes = [12, 8], strides = [1, 1]} : vector<12x64xf32> to vector<12x8xf32>
    %cst_38 = arith.constant dense<0.000000e+00> : vector<8x12xf32>
    %75 = tpu.matmul %72, %73, %cst_38 {dimension_numbers = #tpu.dot_dimension_numbers<[1], [1], [0], [0], [0, 0, 1, 0], [], []>} : vector<8x8xf32>, vector<12x8xf32>, vector<8x12xf32> -> vector<8x12xf32>
    %cst_39 = arith.constant 0.000000e+00 : f32
    %76 = vector.broadcast %cst_39 : f32 to vector<1x12xf32>
    %77 = arith.cmpf ogt, %39, %76 : vector<1x12xf32>
    %cst_40 = arith.constant -3.40282347E+38 : f32
    %78 = vector.shape_cast %77 : vector<1x12xi1> to vector<1x12xi1>
    %79 = vector.broadcast %78 : vector<1x12xi1> to vector<8x12xi1>
    %80 = vector.broadcast %cst_40 : f32 to vector<8x12xf32>
    %81 = arith.select %79, %75, %80 : vector<8x12xi1>, vector<8x12xf32>
    %cst_41 = arith.constant dense<0xFF800000> : vector<8xf32>
    %82 = vector.multi_reduction <maximumf>, %81, %cst_41 [1] : vector<8x12xf32> to vector<8xf32>
    %83 = vector.shape_cast %82 : vector<8xf32> to vector<8x1xf32>
    %84 = vector.broadcast %83 : vector<8x1xf32> to vector<8x12xf32>
    %85 = arith.subf %81, %84 : vector<8x12xf32>
    %86 = math.exp %85 : vector<8x12xf32>
    %cst_42 = arith.constant dense<0.000000e+00> : vector<8xf32>
    %87 = vector.multi_reduction <add>, %86, %cst_42 [1] : vector<8x12xf32> to vector<8xf32>
    %88 = vector.shape_cast %87 : vector<8xf32> to vector<8x1xf32>
    %89 = tpu.reciprocal %88 {approx = true} : vector<8x1xf32> -> vector<8x1xf32>
    %90 = vector.broadcast %89 : vector<8x1xf32> to vector<8x12xf32>
    %91 = arith.mulf %86, %90 : vector<8x12xf32>
    %cst_43 = arith.constant 0.000000e+00 : f32
    %92 = vector.broadcast %cst_43 : f32 to vector<1x12xf32>
    %93 = arith.cmpf ogt, %39, %92 : vector<1x12xf32>
    %cst_44 = arith.constant 0.000000e+00 : f32
    %94 = vector.shape_cast %93 : vector<1x12xi1> to vector<1x12xi1>
    %95 = vector.broadcast %94 : vector<1x12xi1> to vector<8x12xi1>
    %96 = vector.broadcast %cst_44 : f32 to vector<8x12xf32>
    %97 = arith.select %95, %91, %96 : vector<8x12xi1>, vector<8x12xf32>
    %cst_45 = arith.constant dense<0.000000e+00> : vector<8x8xf32>
    %98 = tpu.matmul %97, %74, %cst_45 {dimension_numbers = #tpu.dot_dimension_numbers<[1], [0], [0], [1], [0, 0, 1, 1], [], []>} : vector<8x12xf32>, vector<12x8xf32>, vector<8x8xf32> -> vector<8x8xf32>
    %99 = vector.extract_strided_slice %40 {offsets = [8, 0], sizes = [8, 32], strides = [1, 1]} : vector<32x32xf32> to vector<8x32xf32>
    %cst_46 = arith.constant dense<0.000000e+00> : vector<8x32xf32>
    %100 = tpu.matmul %98, %99, %cst_46 {dimension_numbers = #tpu.dot_dimension_numbers<[1], [0], [0], [1], [0, 0, 1, 1], [], []>} : vector<8x8xf32>, vector<8x32xf32>, vector<8x32xf32> -> vector<8x32xf32>
    %101 = arith.addf %71, %100 : vector<8x32xf32>
    %102 = vector.extract_strided_slice %32 {offsets = [0, 16], sizes = [8, 8], strides = [1, 1]} : vector<8x32xf32> to vector<8x8xf32>
    %103 = vector.extract_strided_slice %37 {offsets = [0, 16], sizes = [12, 8], strides = [1, 1]} : vector<12x64xf32> to vector<12x8xf32>
    %104 = vector.extract_strided_slice %37 {offsets = [0, 48], sizes = [12, 8], strides = [1, 1]} : vector<12x64xf32> to vector<12x8xf32>
    %cst_47 = arith.constant dense<0.000000e+00> : vector<8x12xf32>
    %105 = tpu.matmul %102, %103, %cst_47 {dimension_numbers = #tpu.dot_dimension_numbers<[1], [1], [0], [0], [0, 0, 1, 0], [], []>} : vector<8x8xf32>, vector<12x8xf32>, vector<8x12xf32> -> vector<8x12xf32>
    %cst_48 = arith.constant 0.000000e+00 : f32
    %106 = vector.broadcast %cst_48 : f32 to vector<1x12xf32>
    %107 = arith.cmpf ogt, %39, %106 : vector<1x12xf32>
    %cst_49 = arith.constant -3.40282347E+38 : f32
    %108 = vector.shape_cast %107 : vector<1x12xi1> to vector<1x12xi1>
    %109 = vector.broadcast %108 : vector<1x12xi1> to vector<8x12xi1>
    %110 = vector.broadcast %cst_49 : f32 to vector<8x12xf32>
    %111 = arith.select %109, %105, %110 : vector<8x12xi1>, vector<8x12xf32>
    %cst_50 = arith.constant dense<0xFF800000> : vector<8xf32>
    %112 = vector.multi_reduction <maximumf>, %111, %cst_50 [1] : vector<8x12xf32> to vector<8xf32>
    %113 = vector.shape_cast %112 : vector<8xf32> to vector<8x1xf32>
    %114 = vector.broadcast %113 : vector<8x1xf32> to vector<8x12xf32>
    %115 = arith.subf %111, %114 : vector<8x12xf32>
    %116 = math.exp %115 : vector<8x12xf32>
    %cst_51 = arith.constant dense<0.000000e+00> : vector<8xf32>
    %117 = vector.multi_reduction <add>, %116, %cst_51 [1] : vector<8x12xf32> to vector<8xf32>
    %118 = vector.shape_cast %117 : vector<8xf32> to vector<8x1xf32>
    %119 = tpu.reciprocal %118 {approx = true} : vector<8x1xf32> -> vector<8x1xf32>
    %120 = vector.broadcast %119 : vector<8x1xf32> to vector<8x12xf32>
    %121 = arith.mulf %116, %120 : vector<8x12xf32>
    %cst_52 = arith.constant 0.000000e+00 : f32
    %122 = vector.broadcast %cst_52 : f32 to vector<1x12xf32>
    %123 = arith.cmpf ogt, %39, %122 : vector<1x12xf32>
    %cst_53 = arith.constant 0.000000e+00 : f32
    %124 = vector.shape_cast %123 : vector<1x12xi1> to vector<1x12xi1>
    %125 = vector.broadcast %124 : vector<1x12xi1> to vector<8x12xi1>
    %126 = vector.broadcast %cst_53 : f32 to vector<8x12xf32>
    %127 = arith.select %125, %121, %126 : vector<8x12xi1>, vector<8x12xf32>
    %cst_54 = arith.constant dense<0.000000e+00> : vector<8x8xf32>
    %128 = tpu.matmul %127, %104, %cst_54 {dimension_numbers = #tpu.dot_dimension_numbers<[1], [0], [0], [1], [0, 0, 1, 1], [], []>} : vector<8x12xf32>, vector<12x8xf32>, vector<8x8xf32> -> vector<8x8xf32>
    %129 = vector.extract_strided_slice %40 {offsets = [16, 0], sizes = [8, 32], strides = [1, 1]} : vector<32x32xf32> to vector<8x32xf32>
    %cst_55 = arith.constant dense<0.000000e+00> : vector<8x32xf32>
    %130 = tpu.matmul %128, %129, %cst_55 {dimension_numbers = #tpu.dot_dimension_numbers<[1], [0], [0], [1], [0, 0, 1, 1], [], []>} : vector<8x8xf32>, vector<8x32xf32>, vector<8x32xf32> -> vector<8x32xf32>
    %131 = arith.addf %101, %130 : vector<8x32xf32>
    %132 = vector.extract_strided_slice %32 {offsets = [0, 24], sizes = [8, 8], strides = [1, 1]} : vector<8x32xf32> to vector<8x8xf32>
    %133 = vector.extract_strided_slice %37 {offsets = [0, 24], sizes = [12, 8], strides = [1, 1]} : vector<12x64xf32> to vector<12x8xf32>
    %134 = vector.extract_strided_slice %37 {offsets = [0, 56], sizes = [12, 8], strides = [1, 1]} : vector<12x64xf32> to vector<12x8xf32>
    %cst_56 = arith.constant dense<0.000000e+00> : vector<8x12xf32>
    %135 = tpu.matmul %132, %133, %cst_56 {dimension_numbers = #tpu.dot_dimension_numbers<[1], [1], [0], [0], [0, 0, 1, 0], [], []>} : vector<8x8xf32>, vector<12x8xf32>, vector<8x12xf32> -> vector<8x12xf32>
    %cst_57 = arith.constant 0.000000e+00 : f32
    %136 = vector.broadcast %cst_57 : f32 to vector<1x12xf32>
    %137 = arith.cmpf ogt, %39, %136 : vector<1x12xf32>
    %cst_58 = arith.constant -3.40282347E+38 : f32
    %138 = vector.shape_cast %137 : vector<1x12xi1> to vector<1x12xi1>
    %139 = vector.broadcast %138 : vector<1x12xi1> to vector<8x12xi1>
    %140 = vector.broadcast %cst_58 : f32 to vector<8x12xf32>
    %141 = arith.select %139, %135, %140 : vector<8x12xi1>, vector<8x12xf32>
    %cst_59 = arith.constant dense<0xFF800000> : vector<8xf32>
    %142 = vector.multi_reduction <maximumf>, %141, %cst_59 [1] : vector<8x12xf32> to vector<8xf32>
    %143 = vector.shape_cast %142 : vector<8xf32> to vector<8x1xf32>
    %144 = vector.broadcast %143 : vector<8x1xf32> to vector<8x12xf32>
    %145 = arith.subf %141, %144 : vector<8x12xf32>
    %146 = math.exp %145 : vector<8x12xf32>
    %cst_60 = arith.constant dense<0.000000e+00> : vector<8xf32>
    %147 = vector.multi_reduction <add>, %146, %cst_60 [1] : vector<8x12xf32> to vector<8xf32>
    %148 = vector.shape_cast %147 : vector<8xf32> to vector<8x1xf32>
    %149 = tpu.reciprocal %148 {approx = true} : vector<8x1xf32> -> vector<8x1xf32>
    %150 = vector.broadcast %149 : vector<8x1xf32> to vector<8x12xf32>
    %151 = arith.mulf %146, %150 : vector<8x12xf32>
    %cst_61 = arith.constant 0.000000e+00 : f32
    %152 = vector.broadcast %cst_61 : f32 to vector<1x12xf32>
    %153 = arith.cmpf ogt, %39, %152 : vector<1x12xf32>
    %cst_62 = arith.constant 0.000000e+00 : f32
    %154 = vector.shape_cast %153 : vector<1x12xi1> to vector<1x12xi1>
    %155 = vector.broadcast %154 : vector<1x12xi1> to vector<8x12xi1>
    %156 = vector.broadcast %cst_62 : f32 to vector<8x12xf32>
    %157 = arith.select %155, %151, %156 : vector<8x12xi1>, vector<8x12xf32>
    %cst_63 = arith.constant dense<0.000000e+00> : vector<8x8xf32>
    %158 = tpu.matmul %157, %134, %cst_63 {dimension_numbers = #tpu.dot_dimension_numbers<[1], [0], [0], [1], [0, 0, 1, 1], [], []>} : vector<8x12xf32>, vector<12x8xf32>, vector<8x8xf32> -> vector<8x8xf32>
    %159 = vector.extract_strided_slice %40 {offsets = [24, 0], sizes = [8, 32], strides = [1, 1]} : vector<32x32xf32> to vector<8x32xf32>
    %cst_64 = arith.constant dense<0.000000e+00> : vector<8x32xf32>
    %160 = tpu.matmul %158, %159, %cst_64 {dimension_numbers = #tpu.dot_dimension_numbers<[1], [0], [0], [1], [0, 0, 1, 1], [], []>} : vector<8x8xf32>, vector<8x32xf32>, vector<8x32xf32> -> vector<8x32xf32>
    %161 = arith.addf %131, %160 : vector<8x32xf32>
    %162 = arith.addf %1, %161 : vector<8x32xf32>
    %c0_65 = arith.constant 0 : index
    %c0_66 = arith.constant 0 : index
    %163 = vector.load %arg11[%c0_65, %c0_66] : memref<1x32xf32, #tpu.memory_space<vmem>>, vector<1x32xf32>
    %164 = vector.broadcast %163 : vector<1x32xf32> to vector<8x32xf32>
    %165 = arith.addf %162, %164 : vector<8x32xf32>
    %c0_67 = arith.constant 0 : index
    %c0_68 = arith.constant 0 : index
    %c0_69 = arith.constant 0 : index
    %166 = vector.load %arg12[%c0_67, %c0_68, %c0_69] : memref<1x8x32xf32, #tpu.memory_space<vmem>>, vector<1x8x32xf32>
    %167 = vector.shape_cast %166 : vector<1x8x32xf32> to vector<8x32xf32>
    %168 = vector.shape_cast %165 : vector<8x32xf32> to vector<1x8x32xf32>
    tpu.vector_store %arg12[%c0_67, %c0_68, %c0_69], %168 {strides = array<i32>} : memref<1x8x32xf32, #tpu.memory_space<vmem>>, vector<1x8x32xf32>,
    return
  }
  func.func @transform_0(%arg0: i32) -> (i32, i32, i32) {
    %c0_i32 = arith.constant 0 : i32
    %c0_i32_0 = arith.constant 0 : i32
    %c0_i32_1 = arith.constant 0 : i32
    return %arg0, %c0_i32, %c0_i32_0 : i32, i32, i32
  }
  func.func @transform_1(%arg0: i32) -> (i32, i32, i32) {
    %c0_i32 = arith.constant 0 : i32
    %c0_i32_0 = arith.constant 0 : i32
    %c0_i32_1 = arith.constant 0 : i32
    return %arg0, %c0_i32, %c0_i32_0 : i32, i32, i32
  }
  func.func @transform_2(%arg0: i32) -> (i32, i32, i32) {
    %c0_i32 = arith.constant 0 : i32
    %c0_i32_0 = arith.constant 0 : i32
    %c0_i32_1 = arith.constant 0 : i32
    return %arg0, %c0_i32, %c0_i32_0 : i32, i32, i32
  }
  func.func @transform_3(%arg0: i32) -> (i32, i32) {
    %c0_i32 = arith.constant 0 : i32
    %c0_i32_0 = arith.constant 0 : i32
    %c0_i32_1 = arith.constant 0 : i32
    return %c0_i32, %c0_i32_0 : i32, i32
  }
  func.func @transform_4(%arg0: i32) -> (i32, i32) {
    %c0_i32 = arith.constant 0 : i32
    %c0_i32_0 = arith.constant 0 : i32
    %c0_i32_1 = arith.constant 0 : i32
    return %c0_i32, %c0_i32_0 : i32, i32
  }
  func.func @transform_5(%arg0: i32) -> (i32, i32) {
    %c0_i32 = arith.constant 0 : i32
    %c0_i32_0 = arith.constant 0 : i32
    %c0_i32_1 = arith.constant 0 : i32
    return %c0_i32, %c0_i32_0 : i32, i32
  }
  func.func @transform_6(%arg0: i32) -> (i32, i32) {
    %c0_i32 = arith.constant 0 : i32
    %c0_i32_0 = arith.constant 0 : i32
    %c0_i32_1 = arith.constant 0 : i32
    return %c0_i32, %c0_i32_0 : i32, i32
  }
  func.func @transform_7(%arg0: i32) -> (i32, i32) {
    %c0_i32 = arith.constant 0 : i32
    %c0_i32_0 = arith.constant 0 : i32
    %c0_i32_1 = arith.constant 0 : i32
    return %c0_i32, %c0_i32_0 : i32, i32
  }
  func.func @transform_8(%arg0: i32) -> (i32, i32) {
    %c0_i32 = arith.constant 0 : i32
    %c0_i32_0 = arith.constant 0 : i32
    %c0_i32_1 = arith.constant 0 : i32
    return %c0_i32, %c0_i32_0 : i32, i32
  }
  func.func @transform_9(%arg0: i32) -> (i32, i32) {
    %c0_i32 = arith.constant 0 : i32
    %c0_i32_0 = arith.constant 0 : i32
    %c0_i32_1 = arith.constant 0 : i32
    return %c0_i32, %c0_i32_0 : i32, i32
  }
  func.func @transform_10(%arg0: i32) -> (i32, i32) {
    %c0_i32 = arith.constant 0 : i32
    %c0_i32_0 = arith.constant 0 : i32
    %c0_i32_1 = arith.constant 0 : i32
    return %c0_i32, %c0_i32_0 : i32, i32
  }
  func.func @transform_11(%arg0: i32) -> (i32, i32, i32) {
    %c0_i32 = arith.constant 0 : i32
    %c0_i32_0 = arith.constant 0 : i32
    %c0_i32_1 = arith.constant 0 : i32
    return %arg0, %c0_i32, %c0_i32_0 : i32, i32, i32
  }
}

module attributes {stable_mosaic.version = 11 : i64} {
  func.func @_ffn_block_kernel(%arg0: i32, %arg1: memref<1x8x32xf32, #tpu.memory_space<vmem>>, %arg2: memref<1x32xf32, #tpu.memory_space<vmem>>, %arg3: memref<1x32xf32, #tpu.memory_space<vmem>>, %arg4: memref<32x64xf32, #tpu.memory_space<vmem>>, %arg5: memref<1x64xf32, #tpu.memory_space<vmem>>, %arg6: memref<64x32xf32, #tpu.memory_space<vmem>>, %arg7: memref<1x32xf32, #tpu.memory_space<vmem>>, %arg8: memref<1x8x32xf32, #tpu.memory_space<vmem>>) attributes {dimension_semantics = [#tpu.dimension_semantics<parallel>], iteration_bounds = array<i64: 2>, scalar_prefetch = 0 : i64, scratch_operands = 0 : i64, tpu.core_type = #tpu.core_type<tc>, window_params = [{transform_indices = @transform_0, window_bounds = array<i64: 1, 8, 32>}, {pipeline_mode = #tpu.pipeline_mode<synchronous>, transform_indices = @transform_1, window_bounds = array<i64: 1, 32>}, {pipeline_mode = #tpu.pipeline_mode<synchronous>, transform_indices = @transform_2, window_bounds = array<i64: 1, 32>}, {pipeline_mode = #tpu.pipeline_mode<synchronous>, transform_indices = @transform_3, window_bounds = array<i64: 32, 64>}, {pipeline_mode = #tpu.pipeline_mode<synchronous>, transform_indices = @transform_4, window_bounds = array<i64: 1, 64>}, {pipeline_mode = #tpu.pipeline_mode<synchronous>, transform_indices = @transform_5, window_bounds = array<i64: 64, 32>}, {pipeline_mode = #tpu.pipeline_mode<synchronous>, transform_indices = @transform_6, window_bounds = array<i64: 1, 32>}, {transform_indices = @transform_7, window_bounds = array<i64: 1, 8, 32>}]} {
    %c0 = arith.constant 0 : index
    %c0_0 = arith.constant 0 : index
    %c0_1 = arith.constant 0 : index
    %0 = vector.load %arg1[%c0, %c0_0, %c0_1] : memref<1x8x32xf32, #tpu.memory_space<vmem>>, vector<1x8x32xf32>
    %1 = vector.shape_cast %0 : vector<1x8x32xf32> to vector<8x32xf32>
    %c0_2 = arith.constant 0 : index
    %c0_3 = arith.constant 0 : index
    %2 = vector.load %arg2[%c0_2, %c0_3] : memref<1x32xf32, #tpu.memory_space<vmem>>, vector<1x32xf32>
    %c0_4 = arith.constant 0 : index
    %c0_5 = arith.constant 0 : index
    %3 = vector.load %arg3[%c0_4, %c0_5] : memref<1x32xf32, #tpu.memory_space<vmem>>, vector<1x32xf32>
    %cst = arith.constant dense<0.000000e+00> : vector<8xf32>
    %4 = vector.multi_reduction <add>, %1, %cst [1] : vector<8x32xf32> to vector<8xf32>
    %5 = vector.shape_cast %4 : vector<8xf32> to vector<8x1xf32>
    %cst_6 = arith.constant 3.200000e+01 : f32
    %6 = vector.broadcast %cst_6 : f32 to vector<8x1xf32>
    %7 = arith.divf %5, %6 : vector<8x1xf32>
    %8 = vector.broadcast %7 : vector<8x1xf32> to vector<8x32xf32>
    %9 = arith.subf %1, %8 : vector<8x32xf32>
    %10 = arith.mulf %9, %9 : vector<8x32xf32>
    %cst_7 = arith.constant dense<0.000000e+00> : vector<8xf32>
    %11 = vector.multi_reduction <add>, %10, %cst_7 [1] : vector<8x32xf32> to vector<8xf32>
    %12 = vector.shape_cast %11 : vector<8xf32> to vector<8x1xf32>
    %cst_8 = arith.constant 3.200000e+01 : f32
    %13 = vector.broadcast %cst_8 : f32 to vector<8x1xf32>
    %14 = arith.divf %12, %13 : vector<8x1xf32>
    %15 = vector.broadcast %7 : vector<8x1xf32> to vector<8x32xf32>
    %16 = arith.subf %1, %15 : vector<8x32xf32>
    %cst_9 = arith.constant 9.99999974E-6 : f32
    %17 = vector.broadcast %cst_9 : f32 to vector<8x1xf32>
    %18 = arith.addf %14, %17 : vector<8x1xf32>
    %19 = math.rsqrt %18 : vector<8x1xf32>
    %20 = vector.broadcast %19 : vector<8x1xf32> to vector<8x32xf32>
    %21 = arith.mulf %16, %20 : vector<8x32xf32>
    %22 = vector.broadcast %2 : vector<1x32xf32> to vector<8x32xf32>
    %23 = arith.mulf %21, %22 : vector<8x32xf32>
    %24 = vector.broadcast %3 : vector<1x32xf32> to vector<8x32xf32>
    %25 = arith.addf %23, %24 : vector<8x32xf32>
    %c0_10 = arith.constant 0 : index
    %c0_11 = arith.constant 0 : index
    %26 = vector.load %arg4[%c0_10, %c0_11] : memref<32x64xf32, #tpu.memory_space<vmem>>, vector<32x64xf32>
    %cst_12 = arith.constant dense<0.000000e+00> : vector<8x64xf32>
    %27 = tpu.matmul %25, %26, %cst_12 {dimension_numbers = #tpu.dot_dimension_numbers<[1], [0], [0], [1], [0, 0, 1, 1], [], []>} : vector<8x32xf32>, vector<32x64xf32>, vector<8x64xf32> -> vector<8x64xf32>
    %c0_13 = arith.constant 0 : index
    %c0_14 = arith.constant 0 : index
    %28 = vector.load %arg5[%c0_13, %c0_14] : memref<1x64xf32, #tpu.memory_space<vmem>>, vector<1x64xf32>
    %29 = vector.broadcast %28 : vector<1x64xf32> to vector<8x64xf32>
    %30 = arith.addf %27, %29 : vector<8x64xf32>
    %cst_15 = arith.constant 0.000000e+00 : f32
    %31 = vector.broadcast %cst_15 : f32 to vector<8x64xf32>
    %32 = arith.maximumf %30, %31 : vector<8x64xf32>
    %c0_16 = arith.constant 0 : index
    %c0_17 = arith.constant 0 : index
    %33 = vector.load %arg6[%c0_16, %c0_17] : memref<64x32xf32, #tpu.memory_space<vmem>>, vector<64x32xf32>
    %cst_18 = arith.constant dense<0.000000e+00> : vector<8x32xf32>
    %34 = tpu.matmul %32, %33, %cst_18 {dimension_numbers = #tpu.dot_dimension_numbers<[1], [0], [0], [1], [0, 0, 1, 1], [], []>} : vector<8x64xf32>, vector<64x32xf32>, vector<8x32xf32> -> vector<8x32xf32>
    %35 = arith.addf %1, %34 : vector<8x32xf32>
    %c0_19 = arith.constant 0 : index
    %c0_20 = arith.constant 0 : index
    %36 = vector.load %arg7[%c0_19, %c0_20] : memref<1x32xf32, #tpu.memory_space<vmem>>, vector<1x32xf32>
    %37 = vector.broadcast %36 : vector<1x32xf32> to vector<8x32xf32>
    %38 = arith.addf %35, %37 : vector<8x32xf32>
    %c0_21 = arith.constant 0 : index
    %c0_22 = arith.constant 0 : index
    %c0_23 = arith.constant 0 : index
    %39 = vector.load %arg8[%c0_21, %c0_22, %c0_23] : memref<1x8x32xf32, #tpu.memory_space<vmem>>, vector<1x8x32xf32>
    %40 = vector.shape_cast %39 : vector<1x8x32xf32> to vector<8x32xf32>
    %41 = vector.shape_cast %38 : vector<8x32xf32> to vector<1x8x32xf32>
    tpu.vector_store %arg8[%c0_21, %c0_22, %c0_23], %41 {strides = array<i32>} : memref<1x8x32xf32, #tpu.memory_space<vmem>>, vector<1x8x32xf32>,
    return
  }
  func.func @transform_0(%arg0: i32) -> (i32, i32, i32) {
    %c0_i32 = arith.constant 0 : i32
    %c0_i32_0 = arith.constant 0 : i32
    %c0_i32_1 = arith.constant 0 : i32
    return %arg0, %c0_i32, %c0_i32_0 : i32, i32, i32
  }
  func.func @transform_1(%arg0: i32) -> (i32, i32) {
    %c0_i32 = arith.constant 0 : i32
    %c0_i32_0 = arith.constant 0 : i32
    %c0_i32_1 = arith.constant 0 : i32
    return %c0_i32, %c0_i32_0 : i32, i32
  }
  func.func @transform_2(%arg0: i32) -> (i32, i32) {
    %c0_i32 = arith.constant 0 : i32
    %c0_i32_0 = arith.constant 0 : i32
    %c0_i32_1 = arith.constant 0 : i32
    return %c0_i32, %c0_i32_0 : i32, i32
  }
  func.func @transform_3(%arg0: i32) -> (i32, i32) {
    %c0_i32 = arith.constant 0 : i32
    %c0_i32_0 = arith.constant 0 : i32
    %c0_i32_1 = arith.constant 0 : i32
    return %c0_i32, %c0_i32_0 : i32, i32
  }
  func.func @transform_4(%arg0: i32) -> (i32, i32) {
    %c0_i32 = arith.constant 0 : i32
    %c0_i32_0 = arith.constant 0 : i32
    %c0_i32_1 = arith.constant 0 : i32
    return %c0_i32, %c0_i32_0 : i32, i32
  }
  func.func @transform_5(%arg0: i32) -> (i32, i32) {
    %c0_i32 = arith.constant 0 : i32
    %c0_i32_0 = arith.constant 0 : i32
    %c0_i32_1 = arith.constant 0 : i32
    return %c0_i32, %c0_i32_0 : i32, i32
  }
  func.func @transform_6(%arg0: i32) -> (i32, i32) {
    %c0_i32 = arith.constant 0 : i32
    %c0_i32_0 = arith.constant 0 : i32
    %c0_i32_1 = arith.constant 0 : i32
    return %c0_i32, %c0_i32_0 : i32, i32
  }
  func.func @transform_7(%arg0: i32) -> (i32, i32, i32) {
    %c0_i32 = arith.constant 0 : i32
    %c0_i32_0 = arith.constant 0 : i32
    %c0_i32_1 = arith.constant 0 : i32
    return %arg0, %c0_i32, %c0_i32_0 : i32, i32, i32
  }
}

module attributes {stable_mosaic.version = 11 : i64} {
  func.func @_final_kernel(%arg0: i32, %arg1: memref<1x8x32xf32, #tpu.memory_space<vmem>>, %arg2: memref<1x32xf32, #tpu.memory_space<vmem>>, %arg3: memref<1x32xf32, #tpu.memory_space<vmem>>, %arg4: memref<32x16xf32, #tpu.memory_space<vmem>>, %arg5: memref<1x16xf32, #tpu.memory_space<vmem>>, %arg6: memref<1x8x16xf32, #tpu.memory_space<vmem>>) attributes {dimension_semantics = [#tpu.dimension_semantics<parallel>], iteration_bounds = array<i64: 2>, scalar_prefetch = 0 : i64, scratch_operands = 0 : i64, tpu.core_type = #tpu.core_type<tc>, window_params = [{transform_indices = @transform_0, window_bounds = array<i64: 1, 8, 32>}, {pipeline_mode = #tpu.pipeline_mode<synchronous>, transform_indices = @transform_1, window_bounds = array<i64: 1, 32>}, {pipeline_mode = #tpu.pipeline_mode<synchronous>, transform_indices = @transform_2, window_bounds = array<i64: 1, 32>}, {pipeline_mode = #tpu.pipeline_mode<synchronous>, transform_indices = @transform_3, window_bounds = array<i64: 32, 16>}, {pipeline_mode = #tpu.pipeline_mode<synchronous>, transform_indices = @transform_4, window_bounds = array<i64: 1, 16>}, {transform_indices = @transform_5, window_bounds = array<i64: 1, 8, 16>}]} {
    %c0 = arith.constant 0 : index
    %c0_0 = arith.constant 0 : index
    %c0_1 = arith.constant 0 : index
    %0 = vector.load %arg1[%c0, %c0_0, %c0_1] : memref<1x8x32xf32, #tpu.memory_space<vmem>>, vector<1x8x32xf32>
    %1 = vector.shape_cast %0 : vector<1x8x32xf32> to vector<8x32xf32>
    %c0_2 = arith.constant 0 : index
    %c0_3 = arith.constant 0 : index
    %2 = vector.load %arg2[%c0_2, %c0_3] : memref<1x32xf32, #tpu.memory_space<vmem>>, vector<1x32xf32>
    %c0_4 = arith.constant 0 : index
    %c0_5 = arith.constant 0 : index
    %3 = vector.load %arg3[%c0_4, %c0_5] : memref<1x32xf32, #tpu.memory_space<vmem>>, vector<1x32xf32>
    %cst = arith.constant dense<0.000000e+00> : vector<8xf32>
    %4 = vector.multi_reduction <add>, %1, %cst [1] : vector<8x32xf32> to vector<8xf32>
    %5 = vector.shape_cast %4 : vector<8xf32> to vector<8x1xf32>
    %cst_6 = arith.constant 3.200000e+01 : f32
    %6 = vector.broadcast %cst_6 : f32 to vector<8x1xf32>
    %7 = arith.divf %5, %6 : vector<8x1xf32>
    %8 = vector.broadcast %7 : vector<8x1xf32> to vector<8x32xf32>
    %9 = arith.subf %1, %8 : vector<8x32xf32>
    %10 = arith.mulf %9, %9 : vector<8x32xf32>
    %cst_7 = arith.constant dense<0.000000e+00> : vector<8xf32>
    %11 = vector.multi_reduction <add>, %10, %cst_7 [1] : vector<8x32xf32> to vector<8xf32>
    %12 = vector.shape_cast %11 : vector<8xf32> to vector<8x1xf32>
    %cst_8 = arith.constant 3.200000e+01 : f32
    %13 = vector.broadcast %cst_8 : f32 to vector<8x1xf32>
    %14 = arith.divf %12, %13 : vector<8x1xf32>
    %15 = vector.broadcast %7 : vector<8x1xf32> to vector<8x32xf32>
    %16 = arith.subf %1, %15 : vector<8x32xf32>
    %cst_9 = arith.constant 9.99999974E-6 : f32
    %17 = vector.broadcast %cst_9 : f32 to vector<8x1xf32>
    %18 = arith.addf %14, %17 : vector<8x1xf32>
    %19 = math.rsqrt %18 : vector<8x1xf32>
    %20 = vector.broadcast %19 : vector<8x1xf32> to vector<8x32xf32>
    %21 = arith.mulf %16, %20 : vector<8x32xf32>
    %22 = vector.broadcast %2 : vector<1x32xf32> to vector<8x32xf32>
    %23 = arith.mulf %21, %22 : vector<8x32xf32>
    %24 = vector.broadcast %3 : vector<1x32xf32> to vector<8x32xf32>
    %25 = arith.addf %23, %24 : vector<8x32xf32>
    %c0_10 = arith.constant 0 : index
    %c0_11 = arith.constant 0 : index
    %26 = vector.load %arg4[%c0_10, %c0_11] : memref<32x16xf32, #tpu.memory_space<vmem>>, vector<32x16xf32>
    %cst_12 = arith.constant dense<0.000000e+00> : vector<8x16xf32>
    %27 = tpu.matmul %25, %26, %cst_12 {dimension_numbers = #tpu.dot_dimension_numbers<[1], [0], [0], [1], [0, 0, 1, 1], [], []>} : vector<8x32xf32>, vector<32x16xf32>, vector<8x16xf32> -> vector<8x16xf32>
    %c0_13 = arith.constant 0 : index
    %c0_14 = arith.constant 0 : index
    %28 = vector.load %arg5[%c0_13, %c0_14] : memref<1x16xf32, #tpu.memory_space<vmem>>, vector<1x16xf32>
    %29 = vector.broadcast %28 : vector<1x16xf32> to vector<8x16xf32>
    %30 = arith.addf %27, %29 : vector<8x16xf32>
    %c0_15 = arith.constant 0 : index
    %c0_16 = arith.constant 0 : index
    %c0_17 = arith.constant 0 : index
    %31 = vector.load %arg6[%c0_15, %c0_16, %c0_17] : memref<1x8x16xf32, #tpu.memory_space<vmem>>, vector<1x8x16xf32>
    %32 = vector.shape_cast %31 : vector<1x8x16xf32> to vector<8x16xf32>
    %33 = vector.shape_cast %30 : vector<8x16xf32> to vector<1x8x16xf32>
    tpu.vector_store %arg6[%c0_15, %c0_16, %c0_17], %33 {strides = array<i32>} : memref<1x8x16xf32, #tpu.memory_space<vmem>>, vector<1x8x16xf32>,
    return
  }
  func.func @transform_0(%arg0: i32) -> (i32, i32, i32) {
    %c0_i32 = arith.constant 0 : i32
    %c0_i32_0 = arith.constant 0 : i32
    %c0_i32_1 = arith.constant 0 : i32
    return %arg0, %c0_i32, %c0_i32_0 : i32, i32, i32
  }
  func.func @transform_1(%arg0: i32) -> (i32, i32) {
    %c0_i32 = arith.constant 0 : i32
    %c0_i32_0 = arith.constant 0 : i32
    %c0_i32_1 = arith.constant 0 : i32
    return %c0_i32, %c0_i32_0 : i32, i32
  }
  func.func @transform_2(%arg0: i32) -> (i32, i32) {
    %c0_i32 = arith.constant 0 : i32
    %c0_i32_0 = arith.constant 0 : i32
    %c0_i32_1 = arith.constant 0 : i32
    return %c0_i32, %c0_i32_0 : i32, i32
  }
  func.func @transform_3(%arg0: i32) -> (i32, i32) {
    %c0_i32 = arith.constant 0 : i32
    %c0_i32_0 = arith.constant 0 : i32
    %c0_i32_1 = arith.constant 0 : i32
    return %c0_i32, %c0_i32_0 : i32, i32
  }
  func.func @transform_4(%arg0: i32) -> (i32, i32) {
    %c0_i32 = arith.constant 0 : i32
    %c0_i32_0 = arith.constant 0 : i32
    %c0_i32_1 = arith.constant 0 : i32
    return %c0_i32, %c0_i32_0 : i32, i32
  }
  func.func @transform_5(%arg0: i32) -> (i32, i32, i32) {
    %c0_i32 = arith.constant 0 : i32
    %c0_i32_0 = arith.constant 0 : i32
    %c0_i32_1 = arith.constant 0 : i32
    return %arg0, %c0_i32, %c0_i32_0 : i32, i32, i32
  }
}

</mosaic_0001>

<bundles_post_ra>
// kernel: bi_transformer_decoder_forward.13
= control target key start
LH: loop header
LB: loop body
LE: loop exit
PB: predicated region body
PF: predicated region fallthrough
CT: control target
= control target key end

     0   :  { %s406_s15 = smov 0   ;;  %s435_s0 = inlined_call_operand.vmem [shape: f32[2,8,16], index: 0, kind: input, shape index: {}]   ;;  %s436_s1 = inlined_call_operand.vmem [shape: f32[16,32], index: 1, kind: input, shape index: {}]   ;;  %s437_s2 = inlined_call_operand.vmem [shape: f32[1,32], index: 2, kind: input, shape index: {}]   ;;  %s438_s3 = inlined_call_operand.vmem [shape: f32[8,32], index: 3, kind: input, shape index: {}]   ;;  %s439_s4 = inlined_call_operand.vmem [shape: f32[2,8,32], index: 4, kind: output, shape index: {}]  }
   0x1 LB: > { %s335_s16 = sadd.s32 4294967295, %s376_s15   ;;  %p339_p0 = scmp.ge.s32.totalorder %s376_s15, 1  ;;  %s376_s15 = sphi %s406_s15, %s14_s15  }
   0x2   : > { %p161_p1 = scmp.lt.s32.totalorder %s376_s15, 3 }
   0x4   : > { %p162_p2 = pnand %p339_p0, %p161_p1 }
   0x5   : > { %v194_v0 = vld [vmem:[%s436_s1] sm:$0xff] (!%p162_p2)  ;;  %v195_v1 = vld [vmem:[%s436_s1 + $0x8] sm:$0xff] (!%p162_p2)  ;;  %p185_p3 = scmp.lt.s32.totalorder (!%p162_p2), %s335_s16, 1  ;;  %v378_v2 = vmov (!%p162_p2), 0.0|0.0   ;;  %vm379_vm0 = vmmov (!%p162_p2), 0   ;;  %v380_v4 = vmov (!%p162_p2), 0.0  }
   0x6   : > { %165 = sbr.rel (%p162_p2) target bundleno = 236 (0xec), region = 36  ;;  %356 = vmatprep.subr.bf16.mxu0 (!%p162_p2), %v378_v2  ;;  %v357_v3 = vpack.c.bf16 (!%p162_p2), %v195_v1, %v194_v0  ;;  %353 = vmatprep.mubr.msk.f32.mxu0 (!%p162_p2), %vm379_vm0, %v380_v4  ;;  %vm203_vm1 = vcmask (!%p162_p2), 130048   ;;  %v342_v6 = vld [vmem:[%s437_s2] ss:$0 sm:$0xff] (!%p162_p2)  ;;  %vm280_vm2 = vcmask (!%p162_p2), 261120  }
   0x7   : > { %v278_v10 = vld [vmem:[%s438_s3] sm:$0xff] (!%p162_p2) }
   0x8   : > { %358 = vmatpush3.bf16.msra.mxu0 (!%p162_p2), %v357_v3 }
   0xd   : > { %s441_s16 = smov (!%p185_p3, %s335_s16), 1 }
   0xe   : > { %s340_s21 = sshll.u32 %s441_s16, 3 }
   0xf   : > { %s188_s24 = scalar_lea.vmem %s435_s0, %s340_s21  ;;  %s192_s5 = scalar_lea.vmem %s439_s4, %s340_s21 }
  0x10   : > { %v193_v5 = vld [vmem:[%s188_s24] sm:$0xff] }
  0x11   : > { %354 = vmatmul.mubr.msk.f32.vlgmr.msra.gmra.mrb[0].mxu0 %vm203_vm1, %v193_v5 }
  0xe4   : > { %v273_v7 = vpop.f32.mrb[0].mxu0 }
  0xe5   : > { %v274_v8 = vadd.f32 %v342_v6, %v273_v7  ;;  %v355_v9 = vpop.f32.mrb[1].mxu0 }
  0xe7   : > { %v277_v11 = vmul.f32 5.656854, %v274_v8 }
  0xe9   : > { %v279_v12 = vadd.f32 %v278_v10, %v277_v11 }
  0xeb   : > { %281 = vst.msk [vmem:[%s192_s5] sm:$0xff] %vm280_vm2, %v279_v12 }
  0xec PF: > { %s14_s15 = sadd.s32 1, %s376_s15  }
  0xed   : > { %p11_p4 = scmp.ge.s32.totalorder %s14_s15, 4  }
  0xef   :  { %13 = sbr.rel (!%p11_p4) target bundleno = 1 (0x1), region = 66 }

// kernel: bi_transformer_decoder_forward.16
= control target key start
LH: loop header
LB: loop body
LE: loop exit
PB: predicated region body
PF: predicated region fallthrough
CT: control target
= control target key end

     0   :  { %s677_s24 = smov 0   ;;  %s758_s0 = inlined_call_operand.vmem [shape: f32[2,8,32], index: 0, kind: input, shape index: {}]   ;;  %s759_s1 = inlined_call_operand.vmem [shape: f32[1,32], index: 1, kind: input, shape index: {}]   ;;  %s760_s2 = inlined_call_operand.vmem [shape: f32[1,32], index: 2, kind: input, shape index: {}]   ;;  %s761_s3 = inlined_call_operand.vmem [shape: f32[32,64], index: 3, kind: input, shape index: {}]   ;;  %s762_s4 = inlined_call_operand.vmem [shape: f32[1,64], index: 4, kind: input, shape index: {}]   ;;  %s763_s5 = inlined_call_operand.vmem [shape: f32[64,32], index: 5, kind: input, shape index: {}]   ;;  %s764_s6 = inlined_call_operand.vmem [shape: f32[1,32], index: 6, kind: input, shape index: {}]   ;;  %s765_s7 = inlined_call_operand.vmem [shape: f32[2,8,32], index: 7, kind: output, shape index: {}]  }
   0x1 LB: > { %s536_s25 = sadd.s32 4294967295, %s632_s24   ;;  %p540_p0 = scmp.ge.s32.totalorder %s632_s24, 1  ;;  %s632_s24 = sphi %s677_s24, %s17_s24  }
   0x2   : > { %p236_p1 = scmp.lt.s32.totalorder %s632_s24, 3 }
   0x4   : > { %p237_p2 = pnand %p540_p0, %p236_p1 }
   0x5   : > { %p266_p3 = scmp.lt.s32.totalorder (!%p237_p2), %s536_s25, 1  ;;  %vm277_vm0 = vcmask (!%p237_p2), 261120   ;;  %v306_v7 = vld [vmem:[%s761_s3] sm:$0xff] (!%p237_p2)  ;;  %v307_v8 = vld [vmem:[%s761_s3 + $0x8] sm:$0xff] (!%p237_p2)  ;;  %v308_v9 = vld [vmem:[%s761_s3 + $0x10] sm:$0xff] (!%p237_p2)  ;;  %v634_v10 = vmov (!%p237_p2), 0.0|0.0  }
   0x6   : > { %240 = sbr.rel (%p237_p2) target bundleno = 763 (0x2fb), region = 48  ;;  %595 = vmatprep.subr.bf16.mxu0 (!%p237_p2), %v634_v10  ;;  %v596_v11 = vpack.c.bf16 (!%p237_p2), %v307_v8, %v306_v7  ;;  %v309_v12 = vld [vmem:[%s761_s3 + $0x18] sm:$0xff] (!%p237_p2)  ;;  %vm635_vm1 = vmmov (!%p237_p2), 0   ;;  %v636_v13 = vmov (!%p237_p2), 0.0   ;;  %601 = vmatprep.subr.bf16.mxu1 (!%p237_p2), %v634_v10  ;;  %v391_v15 = vld [vmem:[%s763_s5] sm:$0xff] (!%p237_p2)  ;;  %v392_v16 = vld [vmem:[%s763_s5 + $0x8] sm:$0xff] (!%p237_p2) }
   0x7   : > { %573 = vmatprep.mubr.msk.f32.mxu0 (!%p237_p2), %vm635_vm1, %v636_v13  ;;  %592 = vmatprep.mubr.msk.f32.mxu1 (!%p237_p2), %vm635_vm1, %v636_v13  ;;  %v599_v14 = vpack.c.bf16 (!%p237_p2), %v309_v12, %v308_v9  ;;  %v393_v17 = vld [vmem:[%s763_s5 + $0x10] sm:$0xff] (!%p237_p2)  ;;  %v602_v18 = vpack.c.bf16 (!%p237_p2), %v392_v16, %v391_v15  ;;  %v394_v19 = vld [vmem:[%s763_s5 + $0x18] sm:$0xff] (!%p237_p2)  ;;  %v395_v21 = vld [vmem:[%s763_s5 + $0x20] sm:$0xff] (!%p237_p2)  ;;  %vm399_vm2 = vcmask (!%p237_p2), 523264  }
   0x8   : > { %597 = vmatpush3.bf16.msra.mxu0 (!%p237_p2), %v596_v11  ;;  %v605_v20 = vpack.c.bf16 (!%p237_p2), %v394_v19, %v393_v17  ;;  %v396_v22 = vld [vmem:[%s763_s5 + $0x28] sm:$0xff] (!%p237_p2)  ;;  %v543_v28 = vld [vmem:[%s759_s1] ss:$0 sm:$0xff] (!%p237_p2)  ;;  %v397_v33 = vld [vmem:[%s763_s5 + $0x30] sm:$0xff] (!%p237_p2) }
   0x9   : > { %598 = vmatprep.subr.bf16.mxu0 (!%p237_p2), %v634_v10  ;;  %603 = vmatpush3.bf16.msra.mxu1 (!%p237_p2), %v602_v18  ;;  %v608_v23 = vpack.c.bf16 (!%p237_p2), %v396_v22, %v395_v21  ;;  %v544_v30 = vld [vmem:[%s760_s2] ss:$0 sm:$0xff] (!%p237_p2)  ;;  %v398_v34 = vld [vmem:[%s763_s5 + $0x38] sm:$0xff] (!%p237_p2) }
   0xa   : > { %604 = vmatprep.subr.bf16.mxu1 (!%p237_p2), %v634_v10  ;;  %v611_v35 = vpack.c.bf16 (!%p237_p2), %v398_v34, %v397_v33  ;;  %v545_v36 = vld [vmem:[%s762_s4] ss:$0 sm:$0xff] (!%p237_p2) }
   0xb   : > { %v548_v42 = vld [vmem:[%s764_s6] ss:$0 sm:$0xff] (!%p237_p2) }
   0xc   : > { %600 = vmatpush3.bf16.msra.mxu0 (!%p237_p2), %v599_v14 }
   0xd   : > { %s767_s25 = smov (!%p266_p3, %s536_s25), 1  ;;  %606 = vmatpush3.bf16.msra.mxu1 %v605_v20 }
   0xe   : > { %s541_s26 = sshll.u32 %s767_s25, 3  ;;  %607 = vmatprep.subr.bf16.mxu1 %v634_v10 }
   0xf   : > { %s269_s29 = scalar_lea.vmem %s758_s0, %s541_s26  ;;  %s273_s21 = scalar_lea.vmem %s765_s7, %s541_s26 }
  0x10   : > { %v693_v0 = vld [vmem:[%s269_s29] sm:$0xff] }
  0x11   : > { %v278_v1 = vsel %vm277_vm0, %v693_v0, 0.0  ;;  %609 = vmatpush3.bf16.msra.mxu1 %v608_v23 }
  0x12   : > { %279 = vadd.xlane.f32.xlu0 %v278_v1  ;;  %610 = vmatprep.subr.bf16.mxu1 %v634_v10 }
  0x15   : > { %612 = vmatpush3.bf16.msra.mxu1 %v611_v35 }
  0x9f   : > { %v280_v2 = vpop.xlane.xlu0 %279 }
  0xa0   : > { %v282_v3 = vmul.f32 0.03125, %v280_v2 }
  0xa2   : > { %v283_v4 = vsub.f32 %v693_v0, %v282_v3 }
  0xa4   : > { %v284_v5 = vmul.f32 %v283_v4, %v283_v4 }
  0xa6   : > { %v285_v6 = vsel %vm277_vm0, %v284_v5, 0.0 }
  0xa7   : > { %286 = vadd.xlane.f32.xlu0 %v285_v6 }
 0x134   : > { %v287_v24 = vpop.xlane.xlu0 %286 }
 0x135   : > { %v288_v25 = vmul.f32 0.03125, %v287_v24 }
 0x137   : > { %v289_v26 = vadd.f32 1e-05, %v288_v25 }
 0x139   : > { %624 = vrsqrt.f32 %v289_v26 }
 0x143   : > { %v625_v27 = vpop.eup %624 }
 0x144   : > { %v291_v29 = vmul.f32 %v625_v27, %v283_v4 }
 0x146   : > { %v298_v31 = vmul.f32 %v543_v28, %v291_v29 }
 0x148   : > { %v305_v32 = vadd.f32 %v544_v30, %v298_v31 }
 0x14a   : > { %574 = vmatmul.mubr.msk.f32.vlgmr.msra.gmra.mrb[0].mxu0 %vm277_vm0, %v305_v32 }
 0x21d   : > { %v386_v37 = vpop.f32.mrb[0].mxu0 }
 0x21e   : > { %v387_v38 = vadd.f32 %v545_v36, %v386_v37  ;;  %v575_v39 = vpop.f32.mrb[1].mxu0 }
 0x220   : > { %v390_v40 = vmax.f32 %v387_v38, 0.0 }
 0x222   : > { %593 = vmatmul.mubr.msk.f32.vlgmr.msra.gmra.mrb[0].mxu1 %vm399_vm2, %v390_v40 }
 0x2f5   : > { %v469_v41 = vpop.f32.mrb[0].mxu1 }
 0x2f6   : > { %v473_v43 = vadd.f32 %v469_v41, %v693_v0  ;;  %v594_v44 = vpop.f32.mrb[1].mxu1 }
 0x2f8   : > { %v481_v45 = vadd.f32 %v548_v42, %v473_v43 }
 0x2fa   : > { %482 = vst.msk [vmem:[%s273_s21] sm:$0xff] %vm277_vm0, %v481_v45 }
 0x2fb PF: > { %s17_s24 = sadd.s32 1, %s632_s24  }
 0x2fc   : > { %p14_p4 = scmp.ge.s32.totalorder %s17_s24, 4  }
 0x2fe   :  { %16 = sbr.rel (!%p14_p4) target bundleno = 1 (0x1), region = 78 }

// kernel: bi_transformer_decoder_forward.14
= control target key start
LH: loop header
LB: loop body
LE: loop exit
PB: predicated region body
PF: predicated region fallthrough
CT: control target
= control target key end

     0   :  { %s1721_s27 = smov 0   ;;  %s1886_s0 = inlined_call_operand.vmem [shape: f32[2,8,32], index: 0, kind: input, shape index: {}]   ;;  %s1887_s1 = inlined_call_operand.vmem [shape: f32[2,8,8], index: 1, kind: input, shape index: {}]   ;;  %s1888_s2 = inlined_call_operand.vmem [shape: f32[1,32], index: 2, kind: input, shape index: {}]   ;;  %s1889_s3 = inlined_call_operand.vmem [shape: f32[1,32], index: 3, kind: input, shape index: {}]   ;;  %s1890_s4 = inlined_call_operand.vmem [shape: f32[32,96], index: 4, kind: input, shape index: {}]   ;;  %s1891_s5 = inlined_call_operand.vmem [shape: f32[1,96], index: 5, kind: input, shape index: {}]   ;;  %s1892_s6 = inlined_call_operand.vmem [shape: f32[32,32], index: 6, kind: input, shape index: {}]   ;;  %s1893_s7 = inlined_call_operand.vmem [shape: f32[1,32], index: 7, kind: input, shape index: {}]   ;;  %s1894_s8 = inlined_call_operand.vmem [shape: f32[2,8,32], index: 8, kind: output, shape index: {}]  }
   0x1 LB: > { %s1477_s28 = sadd.s32 4294967295, %s1660_s27   ;;  %p1481_p0 = scmp.ge.s32.totalorder %s1660_s27, 1  ;;  %s1660_s27 = sphi %s1721_s27, %s18_s27  }
   0x2   : > { %p270_p1 = scmp.lt.s32.totalorder %s1660_s27, 3 }
   0x4   : > { %p271_p2 = pnand %p1481_p0, %p270_p1 }
   0x5   : > { %p306_p3 = scmp.lt.s32.totalorder (!%p271_p2), %s1477_s28, 1  ;;  %vm321_vm0 = vcmask (!%p271_p2), 261120   ;;  %v350_v7 = vld [vmem:[%s1890_s4] sm:$0xff] (!%p271_p2)  ;;  %v351_v8 = vld [vmem:[%s1890_s4 + $0x8] sm:$0xff] (!%p271_p2)  ;;  %v352_v9 = vld [vmem:[%s1890_s4 + $0x10] sm:$0xff] (!%p271_p2)  ;;  %v1662_v10 = vmov (!%p271_p2), 0.0|0.0  }
   0x6   : > { %274 = sbr.rel (%p271_p2) target bundleno = 2901 (0xb55), region = 52  ;;  %1608 = vmatprep.subr.bf16.mxu0 (!%p271_p2), %v1662_v10  ;;  %v1609_v11 = vpack.c.bf16 (!%p271_p2), %v351_v8, %v350_v7  ;;  %v353_v12 = vld [vmem:[%s1890_s4 + $0x18] sm:$0xff] (!%p271_p2)  ;;  %vm1663_vm1 = vmmov (!%p271_p2), 0   ;;  %v1664_v13 = vmov (!%p271_p2), 0.0   ;;  %v1485_v19 = vld [vmem:[%s1888_s2] ss:$0 sm:$0xff] (!%p271_p2) }
   0x7   : > { %1545 = vmatprep.mubr.msk.f32.mxu0 (!%p271_p2), %vm1663_vm1, %v1664_v13  ;;  %1548 = vmatprep.subr.mxu1 (!%p271_p2), %v1664_v13  ;;  %v1612_v14 = vpack.c.bf16 (!%p271_p2), %v353_v12, %v352_v9  ;;  %v1486_v21 = vld [vmem:[%s1889_s3] ss:$0 sm:$0xff] (!%p271_p2)  ;;  %s1665_s25 = smov (!%p271_p2), 120   ;;  %s1666_s26 = smov (!%p271_p2), 96   ;;  %vm442_vm2 = vcmask (!%p271_p2), 64512   ;;  %v436_v50 = vld [vmem:[%s1892_s6 + $0x8] sm:$0xff] (!%p271_p2) }
   0x8   : > { %1550 = vmatprep.mubr.msk.f32.mxu1 (!%p271_p2), %vm1663_vm1, %v1664_v13  ;;  %1610 = vmatpush3.bf16.msra.mxu0 (!%p271_p2), %v1609_v11  ;;  %v1487_v24 = vld [vmem:[%s1891_s5] ss:$0 sm:$0xff] (!%p271_p2)  ;;  %s1668_s11 = smov (!%p271_p2), 56   ;;  %s1669_s12 = smov (!%p271_p2), 64  }
   0x9   : > { %1611 = vmatprep.subr.bf16.mxu0 (!%p271_p2), %v1662_v10  ;;  %s1670_s13 = smov (!%p271_p2), 80   ;;  %s1671_s14 = smov (!%p271_p2), 112   ;;  %v435_v61 = vld [vmem:[%s1892_s6] sm:$0xff] (!%p271_p2) }
   0xa   : > { %s1672_s19 = smov (!%p271_p2), 48   ;;  %s1673_s20 = smov (!%p271_p2), 104  }
   0xb   : > { %s1674_s21 = smov (!%p271_p2), 72   ;;  %s1675_s24 = smov (!%p271_p2), 40  }
   0xc   : > { %1613 = vmatpush3.bf16.msra.mxu0 (!%p271_p2), %v1612_v14 }
   0xd   : > { %s1896_s28 = smov (!%p306_p3, %s1477_s28), 1  ;;  %1558 = vmatprep.subr.mxu0 %v1664_v13 }
   0xe   : > { %s1729_s29 = sshll.u32 %s1896_s28, 3  ;;  %s1667_s28 = smov 88  }
   0xf   : > { %s309_s10 = scalar_lea.vmem %s1886_s0, %s1729_s29 }
  0x10   : > { %v1735_v0 = vld [vmem:[%s309_s10] sm:$0xff]  ;;  %s313_s10 = scalar_lea.vmem %s1887_s1, %s1729_s29 }
  0x11   : > { %v322_v1 = vsel %vm321_vm0, %v1735_v0, 0.0  ;;  %v1791_v31 = vld [vmem:[%s313_s10] sm:$0xff] }
  0x12   : > { %323 = vadd.xlane.f32.xlu0 %v322_v1  ;;  %vm517_vm3 = vcmp.gt.f32.partialorder %v1791_v31, 0.0 }
  0x9f   : > { %v324_v2 = vpop.xlane.xlu0 %323 }
  0xa0   : > { %v326_v3 = vmul.f32 0.03125, %v324_v2 }
  0xa2   : > { %v327_v4 = vsub.f32 %v1735_v0, %v326_v3 }
  0xa4   : > { %v328_v5 = vmul.f32 %v327_v4, %v327_v4 }
  0xa6   : > { %v329_v6 = vsel %vm321_vm0, %v328_v5, 0.0 }
  0xa7   : > { %330 = vadd.xlane.f32.xlu0 %v329_v6 }
 0x134   : > { %v331_v15 = vpop.xlane.xlu0 %330 }
 0x135   : > { %v332_v16 = vmul.f32 0.03125, %v331_v15 }
 0x137   : > { %v333_v17 = vadd.f32 1e-05, %v332_v16 }
 0x139   : > { %1636 = vrsqrt.f32 %v333_v17 }
 0x143   : > { %v1637_v18 = vpop.eup %1636 }
 0x144   : > { %v335_v20 = vmul.f32 %v1637_v18, %v327_v4 }
 0x146   : > { %v342_v22 = vmul.f32 %v1485_v19, %v335_v20 }
 0x148   : > { %v349_v23 = vadd.f32 %v1486_v21, %v342_v22 }
 0x14a   : > { %1546 = vmatmul.mubr.msk.f32.vlgmr.msra.gmra.mrb[0].mxu0 %vm321_vm0, %v349_v23 }
 0x14b   : > { %1560 = vmatprep.mubr.msk.f32.mxu0 %vm1663_vm1, %v1664_v13 }
 0x21d   : > { %v430_v25 = vpop.f32.mrb[0].mxu0 }
 0x21e   : > { %v1771_v26 = vadd.f32 %v1487_v24, %v430_v25  ;;  %v1547_v27 = vpop.f32.mrb[1].mxu0 }
 0x220   : > { %607 = vrot.lane.b32.xlu0 %v1771_v26, %s1665_s25  ;;  %440 = vrot.lane.b32.xlu1 %v1771_v26, %s1666_s26 }
 0x224   : > { %609 = vrot.lane.b32.xlu1 %v1771_v26, %s1667_s28 }
 0x292   : > { %v441_v28 = vpop.permute.xlu1 %440  ;;  %v608_v30 = vpop.permute.xlu0 %607 }
 0x293   : > { %1549 = vmatpush3.xpose.msk.msra.mxu1 %vm442_vm2, %v441_v28  ;;  %v437_v28 = vld [vmem:[%s1892_s6 + $0x10] sm:$0xff] }
 0x294   : > { %1553 = vmatprep.subr.mxu1 %v1664_v13 }
 0x296   : > { %1551 = vmatmul.mubr.msk.f32.vlgmr.msra.gmra.mrb[0].mxu1 %vm442_vm2, %v1771_v26  ;;  %v610_v29 = vpop.permute.xlu1 %609 }
 0x297   : > { %1559 = vmatpush3.xpose.msk.msra.mxu0 %vm442_vm2, %v610_v29  ;;  %1555 = vmatprep.mubr.msk.f32.mxu1 %vm1663_vm1, %v1664_v13 }
 0x298   : > { %1568 = vmatprep.subr.mxu0 %v1664_v13 }
 0x29a   : > { %1561 = vmatmul.mubr.msk.f32.vlgmr.msra.gmra.mrb[2].mxu0 %vm442_vm2, %v608_v30 }
 0x29b   : > { %1570 = vmatprep.mubr.msk.f32.mxu0 %vm1663_vm1, %v1664_v13  ;;  %1569 = vmatpush3.msra.mxu0 %v436_v50 }
 0x29c   : > { %1578 = vmatprep.subr.mxu0 %v1664_v13 }
 0x369   : > { %v513_v32 = vpop.f32.mrb[0].mxu1 }
 0x36a   : > { %v518_v33 = vsel %vm517_vm3, %v513_v32, -3.4028235e+38  ;;  %v1552_v34 = vpop.f32.mrb[1].mxu1 }
 0x36b   : > { %v519_v35 = vsel %vm442_vm2, %v518_v33, -inf }
 0x36c   : > { %520 = vmax.xlane.f32.xlu1 %v519_v35 }
 0x36d   : > { %v681_v36 = vpop.f32.mrb[2].mxu0 }
 0x36e   : > { %v685_v37 = vsel %vm517_vm3, %v681_v36, -3.4028235e+38  ;;  %v1562_v38 = vpop.f32.mrb[3].mxu0 }
 0x36f   : > { %v686_v39 = vsel %vm442_vm2, %v685_v37, -inf }
 0x370   : > { %687 = vmax.xlane.f32.xlu0 %v686_v39 }
 0x386   : > { %698 = vrot.lane.b32.xlu0 %v1771_v26, %s1668_s11  ;;  %s317_s11 = scalar_lea.vmem %s1894_s8, %s1729_s29 }
 0x3f9   : > { %v521_v40 = vpop.xlane.xlu1 %520 }
 0x3fa   : > { %v522_v41 = vsub.f32 %v518_v33, %v521_v40 }
 0x3fc   : > { %v523_v42 = vmul.f32 1.442695, %v522_v41 }
 0x3fd   : > { %v688_v43 = vpop.xlane.xlu0 %687 }
 0x3fe   : > { %1638 = vpow2.f32 %v523_v42  ;;  %v689_v44 = vsub.f32 %v685_v37, %v688_v43 }
 0x400   : > { %v690_v45 = vmul.f32 1.442695, %v689_v44 }
 0x401   : > { %v699_v58 = vpop.permute.xlu0 %698 }
 0x402   : > { %1640 = vpow2.f32 %v690_v45 }
 0x408   : > { %v1639_v46 = vpop.eup %1638 }
 0x409   : > { %v525_v47 = vsel %vm442_vm2, %v1639_v46, 0.0 }
 0x40a   : > { %526 = vadd.xlane.f32.xlu1 %v525_v47 }
 0x40c   : > { %v1641_v48 = vpop.eup %1640 }
 0x40d   : > { %v692_v49 = vsel %vm442_vm2, %v1641_v48, 0.0 }
 0x40e   : > { %693 = vadd.xlane.f32.xlu1 %v692_v49 }
 0x41f   : > { %531 = vrot.lane.b32.xlu1 %v1771_v26, %s1669_s12 }
 0x423   : > { %922 = vrot.lane.b32.xlu1 %v1771_v26, %s1670_s13 }
 0x427   : > { %920 = vrot.lane.b32.xlu1 %v1771_v26, %s1671_s14 }
 0x497   : > { %v527_v51 = vpop.xlane.xlu1 %526 }
 0x498   : > { %1642 = vrcp.f32 %v527_v51 }
 0x49b   : > { %v694_v52 = vpop.xlane.xlu1 %693 }
 0x49c   : > { %1644 = vrcp.f32 %v694_v52 }
 0x49f   : > { %v532_v53 = vpop.permute.xlu1 %531 }
 0x4a0   : > { %1554 = vmatpush3.msra.mxu1 %v532_v53  ;;  %v1505_v53 = vld [vmem:[%s1893_s7] ss:$0 sm:$0xff] }
 0x4a1   : > { %1563 = vmatprep.subr.mxu1 %v1664_v13 }
 0x4a2   : > { %v1643_v54 = vpop.eup %1642 }
 0x4a3   : > { %v529_v55 = vmul.f32 %v1643_v54, %v1639_v46  ;;  %v923_v1 = vpop.permute.xlu1 %922 }
 0x4a5   : > { %v530_v56 = vsel %vm517_vm3, %v529_v55, 0.0 }
 0x4a6   : > { %v1645_v57 = vpop.eup %1644  ;;  %1556 = vmatmul.mubr.msk.f32.vlgmr.msra.gmra.mrb[2].mxu1 %vm442_vm2, %v530_v56 }
 0x4a7   : > { %1564 = vmatpush3.msra.mxu1 %v699_v58  ;;  %1565 = vmatprep.mubr.msk.f32.mxu1 %vm1663_vm1, %v1664_v13  ;;  %v696_v59 = vmul.f32 %v1645_v57, %v1641_v48  ;;  %v921_v4 = vpop.permute.xlu1 %920 }
 0x4a8   : > { %1573 = vmatprep.subr.mxu1 %v1664_v13 }
 0x4a9   : > { %v697_v60 = vsel %vm517_vm3, %v696_v59, 0.0 }
 0x4aa   : > { %1566 = vmatmul.mubr.msk.f32.vlgmr.msra.gmra.mrb[4].mxu1 %vm442_vm2, %v697_v60 }
 0x4ab   : > { %1575 = vmatprep.mubr.msk.f32.mxu1 %vm1663_vm1, %v1664_v13  ;;  %1574 = vmatpush3.msra.mxu1 %v435_v61 }
 0x4ac   : > { %1583 = vmatprep.subr.mxu1 %v1664_v13 }
 0x579   : > { %v603_v62 = vpop.f32.mrb[2].mxu1 }
 0x57a   : > { %v1557_v63 = vpop.f32.mrb[3].mxu1  ;;  %1576 = vmatmul.mubr.msk.f32.vlgmr.msra.gmra.mrb[6].mxu1 %vm442_vm2, %v603_v62 }
 0x57b   : > { %1585 = vmatprep.mubr.msk.f32.mxu1 %vm1663_vm1, %v1664_v13 }
 0x57d   : > { %v770_v2 = vpop.f32.mrb[4].mxu1 }
 0x57e   : > { %v1567_v3 = vpop.f32.mrb[5].mxu1  ;;  %1571 = vmatmul.mubr.msk.f32.vlgmr.msra.gmra.mrb[4].mxu0 %vm442_vm2, %v770_v2 }
 0x57f   : > { %1579 = vmatpush3.xpose.msk.msra.mxu0 %vm442_vm2, %v923_v1  ;;  %1580 = vmatprep.mubr.msk.f32.mxu0 %vm1663_vm1, %v1664_v13 }
 0x580   : > { %1588 = vmatprep.subr.mxu0 %v1664_v13 }
 0x582   : > { %1581 = vmatmul.mubr.msk.f32.vlgmr.msra.gmra.mrb[6].mxu0 %vm442_vm2, %v921_v4 }
 0x583   : > { %1590 = vmatprep.mubr.msk.f32.mxu0 %vm1663_vm1, %v1664_v13  ;;  %1589 = vmatpush3.msra.mxu0 %v437_v28 }
 0x584   : > { %1598 = vmatprep.subr.mxu0 %v1664_v13 }
 0x64d   : > { %v916_v5 = vpop.f32.mrb[6].mxu1 }
 0x64e   : > { %v1577_v6 = vpop.f32.mrb[7].mxu1 }
 0x651   : > { %v843_v7 = vpop.f32.mrb[4].mxu0 }
 0x652   : > { %v917_v8 = vadd.f32 %v916_v5, %v843_v7  ;;  %v1572_v9 = vpop.f32.mrb[5].mxu0 }
 0x655   : > { %v994_v10 = vpop.f32.mrb[6].mxu0 }
 0x656   : > { %v998_v11 = vsel %vm517_vm3, %v994_v10, -3.4028235e+38  ;;  %v1582_v12 = vpop.f32.mrb[7].mxu0 }
 0x657   : > { %v999_v14 = vsel %vm442_vm2, %v998_v11, -inf }
 0x658   : > { %1000 = vmax.xlane.f32.xlu1 %v999_v14 }
 0x669   : > { %1011 = vrot.lane.b32.xlu1 %v1771_v26, %s1672_s19 }
 0x66d   : > { %1161 = vrot.lane.b32.xlu1 %v1771_v26, %s1673_s20 }
 0x6e5   : > { %v1001_v15 = vpop.xlane.xlu1 %1000 }
 0x6e6   : > { %v1002_v16 = vsub.f32 %v998_v11, %v1001_v15 }
 0x6e8   : > { %v1003_v17 = vmul.f32 1.442695, %v1002_v16 }
 0x6e9   : > { %v1012_v18 = vpop.permute.xlu1 %1011 }
 0x6ea   : > { %1646 = vpow2.f32 %v1003_v17  ;;  %1584 = vmatpush3.msra.mxu1 %v1012_v18 }
 0x6eb   : > { %1593 = vmatprep.subr.mxu1 %v1664_v13 }
 0x6ed   : > { %v1162_v27 = vpop.permute.xlu1 %1161 }
 0x6f4   : > { %v1647_v19 = vpop.eup %1646 }
 0x6f5   : > { %v1005_v20 = vsel %vm442_vm2, %v1647_v19, 0.0 }
 0x6f6   : > { %1006 = vadd.xlane.f32.xlu0 %v1005_v20 }
 0x70c   : > { %1163 = vrot.lane.b32.xlu0 %v1771_v26, %s1674_s21 }
 0x783   : > { %v1007_v21 = vpop.xlane.xlu0 %1006 }
 0x784   : > { %1648 = vrcp.f32 %v1007_v21 }
 0x787   : > { %v1164_v25 = vpop.permute.xlu0 %1163 }
 0x78e   : > { %v1649_v22 = vpop.eup %1648 }
 0x78f   : > { %v1009_v23 = vmul.f32 %v1649_v22, %v1647_v19 }
 0x791   : > { %v1010_v24 = vsel %vm517_vm3, %v1009_v23, 0.0 }
 0x792   : > { %1586 = vmatmul.mubr.msk.f32.vlgmr.msra.gmra.mrb[8].mxu1 %vm442_vm2, %v1010_v24 }
 0x793   : > { %1594 = vmatpush3.xpose.msk.msra.mxu1 %vm442_vm2, %v1164_v25  ;;  %1595 = vmatprep.mubr.msk.f32.mxu1 %vm1663_vm1, %v1664_v13 }
 0x794   : > { %1603 = vmatprep.subr.mxu1 %v1664_v13 }
 0x796   : > { %1596 = vmatmul.mubr.msk.f32.vlgmr.msra.gmra.mrb[10].mxu1 %vm442_vm2, %v1162_v27 }
 0x797   : > { %1605 = vmatprep.mubr.msk.f32.mxu1 %vm1663_vm1, %v1664_v13 }
 0x865   : > { %v1083_v29 = vpop.f32.mrb[8].mxu1 }
 0x866   : > { %v1587_v30 = vpop.f32.mrb[9].mxu1  ;;  %1591 = vmatmul.mubr.msk.f32.vlgmr.msra.gmra.mrb[8].mxu0 %vm442_vm2, %v1083_v29 }
 0x867   : > { %1600 = vmatprep.mubr.msk.f32.mxu0 %vm1663_vm1, %v1664_v13  ;;  %v438_v13 = vld [vmem:[%s1892_s6 + $0x18] sm:$0xff] }
 0x868   : > { %1604 = vmatpush3.msra.mxu1 %v438_v13 }
 0x869   : > { %v1235_v32 = vpop.f32.mrb[10].mxu1 }
 0x86a   : > { %v1239_v33 = vsel %vm517_vm3, %v1235_v32, -3.4028235e+38  ;;  %v1597_v34 = vpop.f32.mrb[11].mxu1 }
 0x86b   : > { %v1240_v35 = vsel %vm442_vm2, %v1239_v33, -inf }
 0x86c   : > { %1241 = vmax.xlane.f32.xlu1 %v1240_v35 }
 0x8f9   : > { %v1242_v36 = vpop.xlane.xlu1 %1241 }
 0x8fa   : > { %v1243_v37 = vsub.f32 %v1239_v33, %v1242_v36 }
 0x8fc   : > { %v1244_v38 = vmul.f32 1.442695, %v1243_v37 }
 0x8fe   : > { %1650 = vpow2.f32 %v1244_v38 }
 0x908   : > { %v1651_v39 = vpop.eup %1650 }
 0x909   : > { %v1246_v40 = vsel %vm442_vm2, %v1651_v39, 0.0 }
 0x90a   : > { %1247 = vadd.xlane.f32.xlu0 %v1246_v40 }
 0x920   : > { %1252 = vrot.lane.b32.xlu0 %v1771_v26, %s1675_s24 }
 0x939   : > { %v1156_v41 = vpop.f32.mrb[8].mxu0 }
 0x93a   : > { %v1160_v42 = vadd.f32 %v1156_v41, %v917_v8  ;;  %v1592_v43 = vpop.f32.mrb[9].mxu0 }
 0x997   : > { %v1248_v44 = vpop.xlane.xlu0 %1247 }
 0x998   : > { %1652 = vrcp.f32 %v1248_v44 }
 0x99b   : > { %v1253_v45 = vpop.permute.xlu0 %1252 }
 0x99c   : > { %1599 = vmatpush3.msra.mxu0 %v1253_v45 }
 0x9a2   : > { %v1653_v46 = vpop.eup %1652 }
 0x9a3   : > { %v1250_v47 = vmul.f32 %v1653_v46, %v1651_v39 }
 0x9a5   : > { %v1251_v48 = vsel %vm517_vm3, %v1250_v47, 0.0 }
 0x9a6   : > { %1601 = vmatmul.mubr.msk.f32.vlgmr.msra.gmra.mrb[10].mxu0 %vm442_vm2, %v1251_v48 }
 0xa79   : > { %v1324_v26 = vpop.f32.mrb[10].mxu0 }
 0xa7a   : > { %v1602_v49 = vpop.f32.mrb[11].mxu0  ;;  %1606 = vmatmul.mubr.msk.f32.vlgmr.msra.gmra.mrb[12].mxu1 %vm442_vm2, %v1324_v26 }
 0xb4d   : > { %v1397_v50 = vpop.f32.mrb[12].mxu1 }
 0xb4e   : > { %v1401_v51 = vadd.f32 %v1397_v50, %v1160_v42  ;;  %v1607_v52 = vpop.f32.mrb[13].mxu1 }
 0xb50   : > { %v1402_v54 = vadd.f32 %v1401_v51, %v1735_v0 }
 0xb52   : > { %v1410_v31 = vadd.f32 %v1505_v53, %v1402_v54 }
 0xb54   : > { %1411 = vst.msk [vmem:[%s317_s11] sm:$0xff] %vm321_vm0, %v1410_v31 }
 0xb55 PF: > { %s18_s27 = sadd.s32 1, %s1660_s27  }
 0xb56   : > { %p15_p4 = scmp.ge.s32.totalorder %s18_s27, 4  }
 0xb58   :  { %17 = sbr.rel (!%p15_p4) target bundleno = 1 (0x1), region = 85 }

// kernel: bi_transformer_decoder_forward.15
= control target key start
LH: loop header
LB: loop body
LE: loop exit
PB: predicated region body
PF: predicated region fallthrough
CT: control target
= control target key end

     0   :  { %s2100_s17 = smov 0   ;;  %s2311_s0 = inlined_call_operand.vmem [shape: f32[2,8,32], index: 0, kind: input, shape index: {}]   ;;  %s2312_s1 = inlined_call_operand.vmem [shape: f32[2,12,32], index: 1, kind: input, shape index: {}]   ;;  %s2313_s2 = inlined_call_operand.vmem [shape: f32[2,1,12], index: 2, kind: input, shape index: {}]   ;;  %s2314_s3 = inlined_call_operand.vmem [shape: f32[1,32], index: 3, kind: input, shape index: {}]   ;;  %s2315_s4 = inlined_call_operand.vmem [shape: f32[1,32], index: 4, kind: input, shape index: {}]   ;;  %s2316_s5 = inlined_call_operand.vmem [shape: f32[32,32], index: 5, kind: input, shape index: {}]   ;;  %s2317_s6 = inlined_call_operand.vmem [shape: f32[1,32], index: 6, kind: input, shape index: {}]   ;;  %s2318_s7 = inlined_call_operand.vmem [shape: f32[32,64], index: 7, kind: input, shape index: {}]   ;;  %s2319_s8 = inlined_call_operand.vmem [shape: f32[1,64], index: 8, kind: input, shape index: {}]   ;;  %s2320_s9 = inlined_call_operand.vmem [shape: f32[32,32], index: 9, kind: input, shape index: {}]   ;;  %s2321_s10 = inlined_call_operand.vmem [shape: f32[1,32], index: 10, kind: input, shape index: {}]   ;;  %s2322_s11 = inlined_call_operand.vmem [shape: f32[2,8,32], index: 11, kind: output, shape index: {}]  }
   0x1 LB: > { %s1716_s18 = sadd.s32 4294967295, %s2026_s17   ;;  %p1720_p0 = scmp.ge.s32.totalorder %s2026_s17, 1  ;;  %s2026_s17 = sphi %s2100_s17, %s21_s17  }
   0x2   : > { %p354_p1 = scmp.lt.s32.totalorder %s2026_s17, 3 }
   0x4   : > { %p355_p2 = pnand %p1720_p0, %p354_p1 }
   0x5   : > { %p400_p3 = scmp.lt.s32.totalorder (!%p355_p2), %s1716_s18, 1  ;;  %vm421_vm0 = vcmask (!%p355_p2), 261120   ;;  %v534_v7 = vld [vmem:[%s2318_s7] sm:$0xff] (!%p355_p2)  ;;  %v535_v8 = vld [vmem:[%s2318_s7 + $0x8] sm:$0xff] (!%p355_p2)  ;;  %v536_v10 = vld [vmem:[%s2318_s7 + $0x10] sm:$0xff] (!%p355_p2)  ;;  %v2028_v15 = vmov (!%p355_p2), 0.0|0.0   ;;  %v713_v49 = vlaneseq (!%p355_p2) }
   0x6   : > { %358 = sbr.rel (%p355_p2) target bundleno = 3003 (0xbbb), region = 64  ;;  %v1907_v9 = vpack.c.bf16 (!%p355_p2), %v535_v8, %v534_v7  ;;  %v537_v11 = vld [vmem:[%s2318_s7 + $0x18] sm:$0xff] (!%p355_p2)  ;;  %v450_v13 = vld [vmem:[%s2316_s5] sm:$0xff] (!%p355_p2)  ;;  %v451_v14 = vld [vmem:[%s2316_s5 + $0x8] sm:$0xff] (!%p355_p2)  ;;  %1901 = vmatprep.subr.bf16.mxu0 (!%p355_p2), %v2028_v15  ;;  %vm2029_vm1 = vmmov (!%p355_p2), 0   ;;  %v2030_v20 = vmov (!%p355_p2), 0.0  }
   0x7   : > { %v1911_v12 = vpack.c.bf16 (!%p355_p2), %v537_v11, %v536_v10  ;;  %v1902_v16 = vpack.c.bf16 (!%p355_p2), %v451_v14, %v450_v13  ;;  %v452_v17 = vld [vmem:[%s2316_s5 + $0x10] sm:$0xff] (!%p355_p2)  ;;  %v453_v18 = vld [vmem:[%s2316_s5 + $0x18] sm:$0xff] (!%p355_p2)  ;;  %1811 = vmatprep.mubr.msk.f32.mxu0 (!%p355_p2), %vm2029_vm1, %v2030_v20  ;;  %v1725_v27 = vld [vmem:[%s2314_s3] ss:$0 sm:$0xff] (!%p355_p2)  ;;  %vm631_vm2 = vcmask (!%p355_p2), 64512   ;;  %s2031_s14 = smov (!%p355_p2), 96  }
   0x8   : > { %1908 = vmatprep.subr.bf16.mxu1 (!%p355_p2), %v1907_v9  ;;  %v1905_v22 = vpack.c.bf16 (!%p355_p2), %v453_v18, %v452_v17  ;;  %v1726_v29 = vld [vmem:[%s2315_s4] ss:$0 sm:$0xff] (!%p355_p2)  ;;  %vm2174_vm3 = vmpackc.low (!%p355_p2), %vm631_vm2, %vm631_vm2  ;;  %vm740_vm4 = vcmask (!%p355_p2), 1043456   ;;  %vm2032_vm5 = vmmov (!%p355_p2), 1   ;;  %v714_v51 = vshrl.u32 (!%p355_p2), %v713_v49, 7  ;;  %s2034_s23 = smov (!%p355_p2), 120  }
   0x9   : > { %1910 = vmatpush3.bf16.msra.mxu1 (!%p355_p2), %v1907_v9  ;;  %1903 = vmatpush3.bf16.msra.mxu0 (!%p355_p2), %v1902_v16  ;;  %v1729_v32 = vld [vmem:[%s2319_s8] ss:$0 sm:$0xff] (!%p355_p2)  ;;  %vm2184_vm6 = vmpackc.low (!%p355_p2), %vm740_vm4, %vm2032_vm5  ;;  %v2033_v53 = vmov (!%p355_p2), 0   ;;  %vm719_vm9 = vcmask (!%p355_p2), 97280   ;;  %s2035_s26 = smov (!%p355_p2), 112   ;;  %s2036_s27 = smov (!%p355_p2), 104  }
   0xa   : > { %1912 = vmatprep.subr.bf16.mxu1 (!%p355_p2), %v1911_v12  ;;  %1904 = vmatprep.subr.bf16.mxu0 (!%p355_p2), %v2028_v15  ;;  %v1727_v45 = vld [vmem:[%s2317_s6] ss:$0 sm:$0xff] (!%p355_p2)  ;;  %v715_v52 = vsub.s32 (!%p355_p2), 0, %v714_v51  ;;  %s2037_s28 = smov (!%p355_p2), 88   ;;  %s2039_s13 = smov (!%p355_p2), 72  }
   0xb   : > { %v627_v11 = vld [vmem:[%s2320_s9] sm:$0xff] (!%p355_p2) }
   0xd   : > { %s2328_s18 = smov (!%p400_p3, %s1716_s18), 1  ;;  %1914 = vmatpush3.bf16.msra.mxu1 %v1911_v12  ;;  %1906 = vmatpush3.bf16.msra.mxu0 %v1905_v22 }
   0xe   : > { %s1721_s19 = sshll.u32 %s2328_s18, 3  ;;  %s1759_s12 = sshll.u32 %s2328_s18, 4  ;;  %1919 = vmatprep.subr.bf16.mxu1 %v2028_v15  ;;  %1915 = vmatprep.subr.bf16.mxu0 %v2028_v15 }
   0xf   : > { %s403_s22 = scalar_lea.vmem %s2311_s0, %s1721_s19  ;;  %s415_s25 = scalar_lea.vmem %s2322_s11, %s1721_s19 }
  0x10   : > { %v2116_v0 = vld [vmem:[%s403_s22] sm:$0xff]  ;;  %s408_s22 = scalar_lea.vmem %s2312_s1, %s1759_s12  ;;  %s2038_s12 = smov 80  }
  0x11   : > { %v422_v1 = vsel %vm421_vm0, %v2116_v0, 0.0  ;;  %v417_v19 = vld [vmem:[%s408_s22] sm:$0xff]  ;;  %v418_v21 = vld [vmem:[%s408_s22 + $0x8] sm:$0xf]  ;;  %s411_s22 = scalar_lea.vmem %s2313_s2, %s2328_s18 }
  0x12   : > { %423 = vadd.xlane.f32.xlu0 %v422_v1  ;;  %1822 = vmatprep.mubr.msk.f32.mxu1 %vm421_vm0, %v417_v19  ;;  %v626_v50 = vld [vmem:[%s411_s22] sm:$0x1] }
  0x13   : > { %1823 = vmatmul.mubr.msk.f32.vlgmr.msra.gmra.mrb[0].mxu1 %vm421_vm0, %v418_v21  ;;  %vm711_vm7 = vcmp.gt.f32.partialorder %v626_v50, 0.0 }
  0x14   : > { %1836 = vmatprep.mubr.msk.f32.mxu1 %vm2029_vm1, %v2030_v20  ;;  %v712_v54 = vsel %vm711_vm7, 1, %v2033_v53 }
  0x15   : > { %v2201_v55 = vrot.slane %v712_v54, %v715_v52 }
  0x17   : > { %vm717_vm8 = vcmp.eq.s32.totalorder %v2201_v55, 1 }
  0x9f   : > { %v424_v2 = vpop.xlane.xlu0 %423 }
  0xa0   : > { %v426_v3 = vmul.f32 0.03125, %v424_v2 }
  0xa2   : > { %v427_v4 = vsub.f32 %v2116_v0, %v426_v3 }
  0xa4   : > { %v428_v5 = vmul.f32 %v427_v4, %v427_v4 }
  0xa6   : > { %v429_v6 = vsel %vm421_vm0, %v428_v5, 0.0 }
  0xa7   : > { %430 = vadd.xlane.f32.xlu0 %v429_v6 }
  0xe6   : > { %v1824_v33 = vpop.f32.mrb[0].mxu1 }
  0xe7   : > { %v623_v34 = vadd.f32 %v1824_v33, %v1729_v32  ;;  %v617_v35 = vpop.f32.mrb[1].mxu1 }
  0xe8   : > { %v618_v36 = vadd.f32 %v1729_v32, %v617_v35 }
  0xea   : > { %v2178_v38 = vpack.i.bf16 %v623_v34, %v618_v36  ;;  %v1916_v39 = vpack.c.bf16 %v623_v34, %v618_v36  ;;  %v628_v34 = vld [vmem:[%s2320_s9 + $0x8] sm:$0xff] }
  0xec   : > { %1968 = vrot.lane.b32.xlu0 %v2178_v38, %s2031_s14 }
 0x134   : > { %v431_v23 = vpop.xlane.xlu0 %430 }
 0x135   : > { %v432_v24 = vmul.f32 0.03125, %v431_v23 }
 0x137   : > { %v433_v25 = vadd.f32 1e-05, %v432_v24 }
 0x139   : > { %2002 = vrsqrt.f32 %v433_v25 }
 0x143   : > { %v2003_v26 = vpop.eup %2002 }
 0x144   : > { %v435_v28 = vmul.f32 %v2003_v26, %v427_v4 }
 0x146   : > { %v442_v30 = vmul.f32 %v1725_v27, %v435_v28 }
 0x148   : > { %v449_v31 = vadd.f32 %v1726_v29, %v442_v30 }
 0x14a   : > { %1812 = vmatmul.mubr.msk.f32.vlgmr.msra.gmra.mrb[0].mxu0 %vm421_vm0, %v449_v31 }
 0x14b   : > { %1829 = vmatprep.mubr.msk.f32.mxu0 %vm2029_vm1, %v2030_v20  ;;  %1918 = vmatpush3.bf16.xpose.msk.msra.mxu0 %vm2174_vm3, %v1916_v39 }
 0x14c   : > { %1927 = vmatprep.subr.bf16.mxu0 %v2028_v15 }
 0x15e   : > { %v1969_v40 = vpop.permute.xlu0 %1968 }
 0x15f   : > { %v1971_v41 = vunpack.i.h.bf16 %v1969_v40  ;;  %v1970_v42 = vunpack.i.l.bf16 %v1969_v40 }
 0x161   : > { %v1920_v44 = vpack.c.bf16 %v1971_v41, %v1970_v42 }
 0x163   : > { %1922 = vmatpush3.bf16.msk.msra.mxu1 %vm2184_vm6, %v1920_v44 }
 0x164   : > { %1923 = vmatprep.subr.bf16.mxu1 %v2028_v15 }
 0x21d   : > { %v530_v46 = vpop.f32.mrb[0].mxu0 }
 0x21e   : > { %v531_v47 = vadd.f32 %v1727_v45, %v530_v46  ;;  %v1813_v48 = vpop.f32.mrb[1].mxu0 }
 0x220   : > { %1830 = vmatmul.mubr.msk.f32.vlgmr.msra.gmra.mrb[2].mxu0 %vm631_vm2, %v531_v47 }
 0x221   : > { %1850 = vmatprep.mubr.msk.f32.mxu0 %vm2029_vm1, %v2030_v20 }
 0x2f3   : > { %v707_v56 = vpop.f32.mrb[2].mxu0 }
 0x2f4   : > { %v718_v57 = vsel %vm717_vm8, %v707_v56, -3.4028235e+38  ;;  %v1831_v58 = vpop.f32.mrb[3].mxu0 }
 0x2f5   : > { %v720_v59 = vsel %vm719_vm9, %v718_v57, -inf }
 0x2f6   : > { %721 = vmax.xlane.f32.xlu1 %v720_v59 }
 0x307   : > { %1973 = vrot.lane.b32.xlu1 %v2178_v38, %s2034_s23 }
 0x383   : > { %v722_v60 = vpop.xlane.xlu1 %721 }
 0x384   : > { %v723_v61 = vsub.f32 %v718_v57, %v722_v60 }
 0x386   : > { %v724_v62 = vmul.f32 1.442695, %v723_v61 }
 0x387   : > { %v1974_v2 = vpop.permute.xlu1 %1973 }
 0x388   : > { %2004 = vpow2.f32 %v724_v62  ;;  %v1976_v4 = vunpack.i.h.bf16 %v1974_v2  ;;  %v1975_v5 = vunpack.i.l.bf16 %v1974_v2 }
 0x38a   : > { %v1924_v8 = vpack.c.bf16 %v1976_v4, %v1975_v5 }
 0x392   : > { %v2005_v63 = vpop.eup %2004 }
 0x393   : > { %v726_v1 = vsel %vm719_vm9, %v2005_v63, 0.0 }
 0x394   : > { %727 = vadd.xlane.f32.xlu1 %v726_v1 }
 0x3a5   : > { %813 = vrot.lane.b32.xlu1 %v531_v47, %s2034_s23 }
 0x421   : > { %v728_v3 = vpop.xlane.xlu1 %727 }
 0x422   : > { %2006 = vrcp.f32 %v728_v3 }
 0x425   : > { %v814_v10 = vpop.permute.xlu1 %813 }
 0x42c   : > { %v2007_v6 = vpop.eup %2006 }
 0x42d   : > { %v730_v7 = vmul.f32 %v2007_v6, %v2005_v63 }
 0x42f   : > { %v731_v9 = vsel %vm717_vm8, %v730_v7, 0.0 }
 0x430   : > { %1837 = vmatmul.mubr.msk.f32.vlgmr.msra.gmra.mrb[2].mxu1 %vm719_vm9, %v731_v9 }
 0x431   : > { %1926 = vmatpush3.bf16.xpose.msk.msra.mxu1 %vm2174_vm3, %v1924_v8  ;;  %1843 = vmatprep.mubr.msk.f32.mxu1 %vm2029_vm1, %v2030_v20 }
 0x432   : > { %1858 = vmatprep.subr.mxu1 %v2030_v20 }
 0x438   : > { %1844 = vmatmul.mubr.msk.f32.vlgmr.msra.gmra.mrb[4].mxu1 %vm631_vm2, %v814_v10 }
 0x439   : > { %1860 = vmatprep.mubr.msk.f32.mxu1 %vm2029_vm1, %v2030_v20  ;;  %1859 = vmatpush3.msra.mxu1 %v627_v11 }
 0x43a   : > { %1935 = vmatprep.subr.bf16.mxu1 %v2028_v15 }
 0x503   : > { %v809_v12 = vpop.f32.mrb[2].mxu1 }
 0x504   : > { %v1838_v13 = vpop.f32.mrb[3].mxu1  ;;  %1861 = vmatmul.mubr.msk.f32.vlgmr.msra.gmra.mrb[6].mxu1 %vm631_vm2, %v809_v12 }
 0x505   : > { %1874 = vmatprep.mubr.msk.f32.mxu1 %vm2029_vm1, %v2030_v20 }
 0x50b   : > { %v891_v14 = vpop.f32.mrb[4].mxu1 }
 0x50c   : > { %v895_v16 = vsel %vm717_vm8, %v891_v14, -3.4028235e+38  ;;  %v1845_v17 = vpop.f32.mrb[5].mxu1 }
 0x50d   : > { %v896_v18 = vsel %vm719_vm9, %v895_v16, -inf }
 0x50e   : > { %897 = vmax.xlane.f32.xlu1 %v896_v18  ;;  %v629_v18 = vld [vmem:[%s2320_s9 + $0x10] sm:$0xff] }
 0x51f   : > { %1983 = vrot.lane.b32.xlu1 %v2178_v38, %s2035_s26 }
 0x523   : > { %1134 = vrot.lane.b32.xlu1 %v531_v47, %s2035_s26 }
 0x527   : > { %1383 = vrot.lane.b32.xlu1 %v531_v47, %s2036_s27 }
 0x59b   : > { %v898_v19 = vpop.xlane.xlu1 %897 }
 0x59c   : > { %v899_v21 = vsub.f32 %v895_v16, %v898_v19 }
 0x59e   : > { %v900_v22 = vmul.f32 1.442695, %v899_v21 }
 0x59f   : > { %v1984_v36 = vpop.permute.xlu1 %1983 }
 0x5a0   : > { %2008 = vpow2.f32 %v900_v22  ;;  %v1986_v39 = vunpack.i.h.bf16 %v1984_v36  ;;  %v1985_v40 = vunpack.i.l.bf16 %v1984_v36 }
 0x5a2   : > { %v1932_v41 = vpack.c.bf16 %v1986_v39, %v1985_v40 }
 0x5a3   : > { %v1135_v48 = vpop.permute.xlu1 %1134 }
 0x5a7   : > { %v1384_v50 = vpop.permute.xlu1 %1383 }
 0x5aa   : > { %v2009_v23 = vpop.eup %2008 }
 0x5ab   : > { %v902_v24 = vsel %vm719_vm9, %v2009_v23, 0.0 }
 0x5ac   : > { %903 = vadd.xlane.f32.xlu0 %v902_v24 }
 0x5c2   : > { %1978 = vrot.lane.b32.xlu0 %v2178_v38, %s2037_s28 }
 0x5c6   : > { %1988 = vrot.lane.b32.xlu0 %v2178_v38, %s2036_s27 }
 0x5d7   : > { %v1130_v25 = vpop.f32.mrb[6].mxu1 }
 0x5d8   : > { %v1862_v26 = vpop.f32.mrb[7].mxu1 }
 0x639   : > { %v904_v27 = vpop.xlane.xlu0 %903 }
 0x63a   : > { %2010 = vrcp.f32 %v904_v27 }
 0x63d   : > { %v1979_v28 = vpop.permute.xlu0 %1978 }
 0x63e   : > { %v1981_v29 = vunpack.i.h.bf16 %v1979_v28  ;;  %v1980_v30 = vunpack.i.l.bf16 %v1979_v28 }
 0x640   : > { %v1928_v31 = vpack.c.bf16 %v1981_v29, %v1980_v30 }
 0x641   : > { %v1989_v44 = vpop.permute.xlu0 %1988 }
 0x642   : > { %1930 = vmatpush3.bf16.msk.msra.mxu0 %vm2184_vm6, %v1928_v31  ;;  %v1991_v46 = vunpack.i.h.bf16 %v1989_v44  ;;  %v1990_v47 = vunpack.i.l.bf16 %v1989_v44 }
 0x643   : > { %1853 = vmatprep.subr.mxu0 %v2030_v20 }
 0x644   : > { %v2011_v32 = vpop.eup %2010  ;;  %v1940_v49 = vpack.c.bf16 %v1991_v46, %v1990_v47 }
 0x645   : > { %v906_v33 = vmul.f32 %v2011_v32, %v2009_v23 }
 0x647   : > { %v907_v35 = vsel %vm717_vm8, %v906_v33, 0.0 }
 0x648   : > { %1851 = vmatmul.mubr.msk.f32.vlgmr.msra.gmra.mrb[4].mxu0 %vm719_vm9, %v907_v35 }
 0x649   : > { %1854 = vmatpush3.msra.mxu0 %v628_v34  ;;  %1855 = vmatprep.mubr.msk.f32.mxu0 %vm2029_vm1, %v2030_v20 }
 0x64a   : > { %1931 = vmatprep.subr.bf16.mxu0 %v2028_v15 }
 0x71b   : > { %v984_v42 = vpop.f32.mrb[4].mxu0 }
 0x71c   : > { %v1852_v45 = vpop.f32.mrb[5].mxu0  ;;  %1856 = vmatmul.mubr.msk.f32.vlgmr.msra.gmra.mrb[6].mxu0 %vm631_vm2, %v984_v42 }
 0x71d   : > { %1934 = vmatpush3.bf16.xpose.msk.msra.mxu0 %vm2174_vm3, %v1932_v41  ;;  %1867 = vmatprep.mubr.msk.f32.mxu0 %vm2029_vm1, %v2030_v20 }
 0x71e   : > { %1939 = vmatprep.subr.bf16.mxu0 %v2028_v15 }
 0x724   : > { %1868 = vmatmul.mubr.msk.f32.vlgmr.msra.gmra.mrb[8].mxu0 %vm631_vm2, %v1135_v48 }
 0x725   : > { %1942 = vmatpush3.bf16.xpose.msk.msra.mxu0 %vm2174_vm3, %v1940_v49  ;;  %1886 = vmatprep.mubr.msk.f32.mxu0 %vm2029_vm1, %v2030_v20 }
 0x72c   : > { %1887 = vmatmul.mubr.msk.f32.vlgmr.msra.gmra.mrb[10].mxu0 %vm631_vm2, %v1384_v50 }
 0x7ef   : > { %v1057_v51 = vpop.f32.mrb[6].mxu0 }
 0x7f0   : > { %v2258_v52 = vadd.f32 %v1130_v25, %v1057_v51  ;;  %v1857_v53 = vpop.f32.mrb[7].mxu0 }
 0x7f7   : > { %v1212_v54 = vpop.f32.mrb[8].mxu0 }
 0x7f8   : > { %v1216_v56 = vsel %vm717_vm8, %v1212_v54, -3.4028235e+38  ;;  %v1869_v57 = vpop.f32.mrb[9].mxu0 }
 0x7f9   : > { %v1217_v58 = vsel %vm719_vm9, %v1216_v56, -inf }
 0x7fa   : > { %1218 = vmax.xlane.f32.xlu0 %v1217_v58 }
 0x7ff   : > { %v1461_v37 = vpop.f32.mrb[10].mxu0 }
 0x800   : > { %v1888_v59 = vpop.f32.mrb[11].mxu0  ;;  %v1465_v6 = vsel %vm717_vm8, %v1461_v37, -3.4028235e+38 }
 0x801   : > { %v1466_v7 = vsel %vm719_vm9, %v1465_v6, -inf }
 0x810   : > { %1993 = vrot.lane.b32.xlu0 %v2178_v38, %s2038_s12 }
 0x887   : > { %v1219_v60 = vpop.xlane.xlu0 %1218 }
 0x888   : > { %v1220_v61 = vsub.f32 %v1216_v56, %v1219_v60 }
 0x88a   : > { %v1221_v62 = vmul.f32 1.442695, %v1220_v61 }
 0x88b   : > { %v1994_v63 = vpop.permute.xlu0 %1993 }
 0x88c   : > { %2012 = vpow2.f32 %v1221_v62  ;;  %v1996_v1 = vunpack.i.h.bf16 %v1994_v63  ;;  %v1995_v2 = vunpack.i.l.bf16 %v1994_v63 }
 0x88e   : > { %v1936_v3 = vpack.c.bf16 %v1996_v1, %v1995_v2 }
 0x890   : > { %1938 = vmatpush3.bf16.msk.msra.mxu1 %vm2184_vm6, %v1936_v3 }
 0x891   : > { %1877 = vmatprep.subr.mxu1 %v2030_v20 }
 0x896   : > { %v2013_v4 = vpop.eup %2012 }
 0x897   : > { %v1223_v5 = vsel %vm719_vm9, %v2013_v4, 0.0 }
 0x898   : > { %1224 = vadd.xlane.f32.xlu1 %v1223_v5 }
 0x89c   : > { %1467 = vmax.xlane.f32.xlu1 %v1466_v7 }
 0x925   : > { %v1225_v8 = vpop.xlane.xlu1 %1224 }
 0x926   : > { %2014 = vrcp.f32 %v1225_v8 }
 0x929   : > { %v1468_v9 = vpop.xlane.xlu1 %1467 }
 0x92a   : > { %v1469_v10 = vsub.f32 %v1465_v6, %v1468_v9 }
 0x92c   : > { %v1470_v11 = vmul.f32 1.442695, %v1469_v10 }
 0x92e   : > { %2016 = vpow2.f32 %v1470_v11 }
 0x930   : > { %v2015_v12 = vpop.eup %2014 }
 0x931   : > { %v1227_v13 = vmul.f32 %v2015_v12, %v2013_v4 }
 0x933   : > { %v1228_v14 = vsel %vm717_vm8, %v1227_v13, 0.0 }
 0x934   : > { %1875 = vmatmul.mubr.msk.f32.vlgmr.msra.gmra.mrb[8].mxu1 %vm719_vm9, %v1228_v14 }
 0x935   : > { %1879 = vmatprep.mubr.msk.f32.mxu1 %vm2029_vm1, %v2030_v20  ;;  %1878 = vmatpush3.msra.mxu1 %v629_v18 }
 0x936   : > { %1943 = vmatprep.subr.bf16.mxu1 %v2028_v15 }
 0x938   : > { %v2017_v16 = vpop.eup %2016 }
 0x939   : > { %v1472_v17 = vsel %vm719_vm9, %v2017_v16, 0.0 }
 0x93a   : > { %1473 = vadd.xlane.f32.xlu1 %v1472_v17 }
 0x94b   : > { %1998 = vrot.lane.b32.xlu1 %v2178_v38, %s2039_s13  ;;  %v630_v38 = vld [vmem:[%s2320_s9 + $0x18] sm:$0xff] }
 0x9c7   : > { %v1474_v19 = vpop.xlane.xlu1 %1473 }
 0x9c8   : > { %2018 = vrcp.f32 %v1474_v19 }
 0x9cb   : > { %v1999_v21 = vpop.permute.xlu1 %1998 }
 0x9cc   : > { %v2001_v22 = vunpack.i.h.bf16 %v1999_v21  ;;  %v2000_v23 = vunpack.i.l.bf16 %v1999_v21 }
 0x9ce   : > { %v1944_v25 = vpack.c.bf16 %v2001_v22, %v2000_v23 }
 0x9d2   : > { %v2019_v24 = vpop.eup %2018 }
 0x9d3   : > { %v1476_v27 = vmul.f32 %v2019_v24, %v2017_v16 }
 0x9d5   : > { %v1477_v15 = vsel %vm717_vm8, %v1476_v27, 0.0 }
 0xa07   : > { %v1305_v26 = vpop.f32.mrb[8].mxu1 }
 0xa08   : > { %v1876_v28 = vpop.f32.mrb[9].mxu1  ;;  %1880 = vmatmul.mubr.msk.f32.vlgmr.msra.gmra.mrb[10].mxu1 %vm631_vm2, %v1305_v26 }
 0xa09   : > { %1946 = vmatpush3.bf16.msk.msra.mxu1 %vm2184_vm6, %v1944_v25  ;;  %1893 = vmatprep.mubr.msk.f32.mxu1 %vm2029_vm1, %v2030_v20 }
 0xa0a   : > { %1896 = vmatprep.subr.mxu1 %v2030_v20 }
 0xa0c   : > { %1894 = vmatmul.mubr.msk.f32.vlgmr.msra.gmra.mrb[12].mxu1 %vm719_vm9, %v1477_v15 }
 0xa0d   : > { %1898 = vmatprep.mubr.msk.f32.mxu1 %vm2029_vm1, %v2030_v20  ;;  %1897 = vmatpush3.msra.mxu1 %v630_v38  ;;  %v1756_v20 = vld [vmem:[%s2321_s10] ss:$0 sm:$0xff] }
 0xadb   : > { %v1378_v43 = vpop.f32.mrb[10].mxu1 }
 0xadc   : > { %v1382_v29 = vadd.f32 %v1378_v43, %v2258_v52  ;;  %v1881_v30 = vpop.f32.mrb[11].mxu1 }
 0xadf   : > { %v1554_v31 = vpop.f32.mrb[12].mxu1 }
 0xae0   : > { %v1895_v32 = vpop.f32.mrb[13].mxu1  ;;  %1899 = vmatmul.mubr.msk.f32.vlgmr.msra.gmra.mrb[14].mxu1 %vm631_vm2, %v1554_v31 }
 0xbb3   : > { %v1627_v55 = vpop.f32.mrb[14].mxu1 }
 0xbb4   : > { %v1631_v33 = vadd.f32 %v1627_v55, %v1382_v29  ;;  %v1900_v34 = vpop.f32.mrb[15].mxu1 }
 0xbb6   : > { %v1632_v35 = vadd.f32 %v1631_v33, %v2116_v0 }
 0xbb8   : > { %v1640_v36 = vadd.f32 %v1756_v20, %v1632_v35 }
 0xbba   : > { %1641 = vst.msk [vmem:[%s415_s25] sm:$0xff] %vm421_vm0, %v1640_v36 }
 0xbbb PF: > { %s21_s17 = sadd.s32 1, %s2026_s17  }
 0xbbc   : > { %p18_p4 = scmp.ge.s32.totalorder %s21_s17, 4  }
 0xbbe   :  { %20 = sbr.rel (!%p18_p4) target bundleno = 1 (0x1), region = 100 }

// kernel: bi_transformer_decoder_forward.20
= control target key start
LH: loop header
LB: loop body
LE: loop exit
PB: predicated region body
PF: predicated region fallthrough
CT: control target
= control target key end

     0   :  { %10 = vsyncpa [#allocation3], 0  ;;  %s713_s0 = inlined_call_operand.vmem [shape: f32[2,8,32], index: 0, kind: input, shape index: {}]   ;;  %s714_s1 = inlined_call_operand.vmem [shape: f32[1,32], index: 1, kind: input, shape index: {}]   ;;  %s715_s2 = inlined_call_operand.vmem [shape: f32[1,32], index: 2, kind: input, shape index: {}]   ;;  %s716_s3 = inlined_call_operand.vmem [shape: f32[32,16], index: 3, kind: input, shape index: {}]   ;;  %s717_s4 = inlined_call_operand.vmem [shape: f32[1,16], index: 4, kind: input, shape index: {}]   ;;  %s718_s5 = inlined_call_operand.hbm [shape: f32[2,8,16], index: 5, kind: output, shape index: {}]  }
   0x1   :  { %12 = vsyncpa [#allocation3 + $0x1], 0  ;;  %s589_s18 = smov 0   ;;  %s591_s19 = smov 0  }
   0x2   :  { %s593_s20 = smov 0   ;;  %s595_s21 = smov 0  }
   0x3 LB: > { %s610_s22 = sadd.s32 4294967295, %s553_s21   ;;  %s411_s23 = sadd.s32 4294967294, %s553_s21   ;;  %s553_s21 = sphi %s595_s21, %s724_s21   ;;  %s549_s20 = sphi %s593_s20, %s723_s20   ;;  %s545_s19 = sphi %s591_s19, %s722_s19   ;;  %s541_s18 = sphi %s589_s18, %s721_s18  }
   0x4   : > { %s614_s24 = sadd.s32 1, %s553_s21   ;;  %s135_s25 = sadd.s32 1, %s549_s20 }
   0x5   : > { %s132_s26 = ssub.s32 %s553_s21, %s614_s24  ;;  %p145_p0 = scmp.ne.s32.totalorder %s549_s20, %s545_s19 }
   0x6   : > { %p133_p1 = scmp.eq.s32.totalorder %s132_s26, 0  ;;  %p146_p2 = scmp.eq.s32.totalorder %s610_s22, 1 }
   0x7   : > { %p151_p3 = scmp.ne.s32.totalorder %s545_s19, %s541_s18  ;;  %p152_p4 = scmp.eq.s32.totalorder %s411_s23, 1 }
   0x8   : > { %s625_s27 = scalar_select %p133_p1, %s549_s20, %s135_s25  }
   0x9   : > { %p627_p5 = por %p146_p2, %p145_p0  ;;  %p631_p6 = por %p152_p4, %p151_p3 }
   0xa   : > { %p414_p7 = scmp.ge.s32.totalorder %s553_s21, 1  ;;  %p189_p8 = scmp.lt.s32.totalorder %s553_s21, 3 }
   0xc   : > { %p190_p9 = pnand %p414_p7, %p189_p8 }
   0xd   : > { %p216_p10 = scmp.lt.s32.totalorder (!%p190_p9), %s610_s22, 1  ;;  %vm223_vm0 = vcmask (!%p190_p9), 261120   ;;  %v252_v7 = vld [vmem:[%s716_s3] sm:$0xff] (!%p190_p9)  ;;  %v253_v8 = vld [vmem:[%s716_s3 + $0x8] sm:$0xff] (!%p190_p9)  ;;  %v254_v9 = vld [vmem:[%s716_s3 + $0x10] sm:$0xff] (!%p190_p9)  ;;  %v555_v10 = vmov (!%p190_p9), 0.0|0.0  }
   0xe   : > { %193 = sbr.rel (%p190_p9) target bundleno = 567 (0x237), region = 40  ;;  %441 = vmatprep.subr.bf16.mxu0 (!%p190_p9), %v555_v10  ;;  %v442_v11 = vpack.c.bf16 (!%p190_p9), %v253_v8, %v252_v7  ;;  %v255_v12 = vld [vmem:[%s716_s3 + $0x18] sm:$0xff] (!%p190_p9)  ;;  %vm556_vm1 = vmmov (!%p190_p9), 0   ;;  %v557_v13 = vmov (!%p190_p9), 0.0   ;;  %v417_v19 = vld [vmem:[%s714_s1] ss:$0 sm:$0xff] (!%p190_p9) }
   0xf   : > { %438 = vmatprep.mubr.msk.f32.mxu0 (!%p190_p9), %vm556_vm1, %v557_v13  ;;  %v445_v14 = vpack.c.bf16 (!%p190_p9), %v255_v12, %v254_v9  ;;  %v418_v21 = vld [vmem:[%s715_s2] ss:$0 sm:$0xff] (!%p190_p9)  ;;  %s422_s10 = sshll.u32 (!%p190_p9), %s610_s22, 7  ;;  %vm336_vm2 = vcmask (!%p190_p9), 130048  }
  0x10   : > { %443 = vmatpush3.bf16.msra.mxu0 (!%p190_p9), %v442_v11  ;;  %v419_v24 = vld [vmem:[%s717_s4] ss:$0 sm:$0xff] (!%p190_p9)  ;;  %s671_s15 = scalar_lea.hbm (!%p190_p9), %s718_s5, %s422_s10 }
  0x11   : > { %444 = vmatprep.subr.bf16.mxu0 (!%p190_p9), %v555_v10 }
  0x14   : > { %446 = vmatpush3.bf16.msra.mxu0 (!%p190_p9), %v445_v14 }
  0x15   : > { %s217_s30 = scalar_select %p216_p10, %s610_s22, 1 }
  0x16   : > { %s558_s22 = smov [#allocation2]  }
  0x17   : > { %s416_s6 = sshll.u32 %s217_s30, 3  ;;  %s495_s23 = sshll.u32 %s558_s22, 4  ;;  %s496_s23 = int_to_ptr.vmem [resolvable:$false] %s495_s23 }
  0x18   : > { %s219_s9 = scalar_lea.vmem %s713_s0, %s416_s6  ;;  %s213_s6 = sand.u32 1, %s545_s19  }
  0x19   : > { %v220_v0 = vld [vmem:[%s219_s9] sm:$0xff]  ;;  %s415_s7 = sshll.u32 %s213_s6, 3  ;;  %s339_s16 = scalar_lea.sflag [#allocation3], %s213_s6 }
  0x1a   : > { %v224_v1 = vsel %vm223_vm0, %v220_v0, 0.0  ;;  %s215_s11 = scalar_lea.vmem [#allocation2], %s415_s7  ;;  %s497_s25 = scalar_lea.vmem %s496_s23, 256 }
  0x1b   : > { %225 = vadd.xlane.f32.xlu0 %v224_v1  ;;  %s352_s12 = sshll.u32 %s215_s11, 4  ;;  %s673_s12 = int_to_ptr.vmem [resolvable:$true] %s352_s12 }
  0x1c   : > { %s491_s17 = scalar_lea.vmem %s673_s12, 128  ;;  %p498_p0 = scmp.lt.s32.totalorder %s673_s12, %s496_s23 }
  0x1d   : > { %p492_p11 = scmp.ne.s32.totalorder %s673_s12, %s491_s17  ;;  %p499_p1 = scmp.lt.s32.totalorder %s497_s25, %s491_s17 }
  0x1f   : > { %p493_p12 = pnand %p492_p11, %p627_p5  ;;  %p500_p2 = por %p499_p1, %p498_p0 }
  0x21   : > { %p494_p13 = pneg %p493_p12 }
  0x23   : > { %p501_p3 = pnand %p500_p2, %p494_p13 }
  0xa8   : > { %v226_v2 = vpop.xlane.xlu0 %225 }
  0xa9   : > { %v228_v3 = vmul.f32 0.03125, %v226_v2 }
  0xab   : > { %v229_v4 = vsub.f32 %v220_v0, %v228_v3 }
  0xad   : > { %v230_v5 = vmul.f32 %v229_v4, %v229_v4 }
  0xaf   : > { %v231_v6 = vsel %vm223_vm0, %v230_v5, 0.0 }
  0xb0   : > { %232 = vadd.xlane.f32.xlu0 %v231_v6 }
 0x13d   : > { %v233_v15 = vpop.xlane.xlu0 %232 }
 0x13e   : > { %v234_v16 = vmul.f32 0.03125, %v233_v15 }
 0x140   : > { %v235_v17 = vadd.f32 1e-05, %v234_v16 }
 0x142   : > { %489 = vrsqrt.f32 %v235_v17 }
 0x14c   : > { %v490_v18 = vpop.eup %489 }
 0x14d   : > { %v237_v20 = vmul.f32 %v490_v18, %v229_v4 }
 0x14f   : > { %v244_v22 = vmul.f32 %v417_v19, %v237_v20 }
 0x151   : > { %v251_v23 = vadd.f32 %v418_v21, %v244_v22 }
 0x153   : > { %439 = vmatmul.mubr.msk.f32.vlgmr.msra.gmra.mrb[0].mxu0 %vm223_vm0, %v251_v23 }
 0x226   : > { %v332_v25 = vpop.f32.mrb[0].mxu0 }
 0x227   : > { %v333_v26 = vadd.f32 %v419_v24, %v332_v25  ;;  %v440_v27 = vpop.f32.mrb[1].mxu0 }
 0x229   : > { %337 = vst.msk [vmem:[%s215_s11] sm:$0xff] %vm336_vm2, %v333_v26 }
 0x22a   : > { %504 = shalt.err (!%p501_p3)
}
 0x22b   : > { %s505_s26 = scalar_lea.hbm %s671_s15, 128  ;;  %s509_s7 = scalar_lea.hbm %s718_s5, 256 }
 0x22c   : > { %p506_p4 = scmp.ne.s32.totalorder %s671_s15, %s505_s26  ;;  %p510_p9 = scmp.lt.u32.totalorder %s671_s15, %s718_s5 }
 0x22d   : > { %p511_p10 = scmp.lt.u32.totalorder %s509_s7, %s505_s26  ;;  %p513_p12 = scmp.lt.u32.totalorder %s505_s26, %s671_s15 }
 0x22e   : > { %p507_p7 = pnand %p506_p4, %p627_p5 }
 0x22f   : > { %p512_p11 = por %p511_p10, %p510_p9 }
 0x230   : > { %p508_p8 = pneg %p507_p7 }
 0x231   : > { %p514_p13 = por %p513_p12, %p512_p11 }
 0x233   : > { %p515_p0 = pnand %p514_p13, %p508_p8 }
 0x235   : > { %518 = shalt.err (!%p515_p0)
}
 0x236   : > { %447 = dma.vmem_to_hbm [thread:$0]  (%p627_p5), %s673_s12, 128, %s671_s15, %s339_s16  }
 0x237 PF: > { %p453_p1 = scmp.ge.s32.totalorder %s553_s21, 2  ;;  %s364_s10 = sand.u32 1, %s541_s18  }
 0x238   : > { %s365_s11 = scalar_lea.sflag [#allocation3], %s364_s10 }
 0x239   : > { %p450_p2 = pnand %p453_p1, %p631_p6 }
 0x23b   : > { %536 = dma.done.wait (!%p450_p2), %s365_s11, 128  }
 0x23c   : > { %538 = vsyncadd (!%p450_p2), %s365_s11, 4294967168  ;;  %p15_p3 = scmp.ge.s32.totalorder %s614_s24, 4   ;;  %s721_s18 = smov %s545_s19 }
 0x23d   : > { %s722_s19 = smov %s549_s20  ;;  %s723_s20 = smov %s625_s27 }
 0x23e   : > { %s724_s21 = smov %s614_s24  ;;  %17 = sbr.rel (!%p15_p3) target bundleno = 3 (0x3), region = 75 }
 0x245   :  { %370 = vsyncpa [#allocation3], 1 }
 0x246   :  { %372 = vsyncpa [#allocation3 + $0x1], 1 }

</bundles_post_ra>
